<compile_context>
chip_gen: v7x
topology: tpu7x:2x2x1
jax: 0.10.0
libtpu: 0.0.40
codegen_flags: <defaults>
</compile_context>

<pallas_src>
import jax
import jax.numpy as jnp
from jax.experimental import pallas as pl
from jax.experimental.pallas import tpu as pltpu


def _round_up(n, m):
    return ((n + m - 1) // m) * m


def _leaky_relu(h, negative_slope=0.15):
    return jnp.where(h > 0, h, negative_slope * h)


def vae_kernel(
    # per-grid-step inputs
    x_ref, eps_ref,
    # encoder params (resident, constant index_map)
    e_w1, e_b1, e_w2, e_b2, e_wmv, e_bmv,
    # decoder params
    d_w1, d_b1, d_w2, d_b2, d_w3, d_b3,
    # outputs
    mv_ref, out_ref,
):
    lp = eps_ref.shape[1]  # padded latent dim (multiple of 128)

    x = x_ref[...]  # bf16 tile [BM, Dp]

    # ---------------- Encoder ----------------
    h = jnp.dot(x, e_w1[...], preferred_element_type=jnp.float32) + e_b1[...]
    h = _leaky_relu(h)
    h = jnp.dot(h.astype(e_w2.dtype), e_w2[...],
                preferred_element_type=jnp.float32) + e_b2[...]
    h = _leaky_relu(h)
    # fused mean / log_var head: single MXU dispatch, lane-dense output
    mv = jnp.dot(h.astype(e_wmv.dtype), e_wmv[...],
                 preferred_element_type=jnp.float32) + e_bmv[...]
    mean = mv[:, :lp]        # slices at a 128-lane boundary (no relayout)
    log_var = mv[:, lp:]

    # ---------------- Reparameterise ----------------
    var = jnp.exp(0.5 * log_var)          # EUP, f32
    z = mean + var * eps_ref[...]

    # ---------------- Decoder ----------------
    d = jnp.dot(z.astype(d_w1.dtype), d_w1[...],
                preferred_element_type=jnp.float32) + d_b1[...]
    d = _leaky_relu(d)
    d = jnp.dot(d.astype(d_w2.dtype), d_w2[...],
                preferred_element_type=jnp.float32) + d_b2[...]
    d = _leaky_relu(d)
    o = jnp.dot(d.astype(d_w3.dtype), d_w3[...],
                preferred_element_type=jnp.float32) + d_b3[...]
    # sigmoid: exp on EUP, approximate reciprocal on EUP (frees VALU slots)
    out = pl.reciprocal(1.0 + jnp.exp(-o), approx=True)

    mv_ref[...] = mv
    out_ref[...] = out


@jax.jit
def vae_forward(x, eps, kp):
    """Full VAE forward pass in one Pallas kernel, gridded over the batch.

    x:   [B, input_dim]  float32
    eps: [B, latent_dim] float32  (standard-normal noise, supplied by caller
         so the kernel stays deterministic / functional)
    kp:  padded/fused bf16 kernel params from prepare_kernel_params().
    Returns (mean, log_var, output) with logical (unpadded) shapes.
    """
    B, D = x.shape
    L = eps.shape[1]
    Dp, Hp = kp["e_w1"].shape
    Lp = kp["d_w1"].shape[0]

    # Batch tile: 128 rows per grid step when possible (sublane multiple of 8).
    BM = 128 if B >= 128 else _round_up(B, 8)
    Bp = _round_up(B, BM)

    x_p = jnp.pad(x, ((0, Bp - B), (0, Dp - D))).astype(jnp.bfloat16)
    eps_p = jnp.pad(eps, ((0, Bp - B), (0, Lp - L))).astype(jnp.float32)

    ordered = (
        x_p, eps_p,
        kp["e_w1"], kp["e_b1"], kp["e_w2"], kp["e_b2"],
        kp["e_wmv"], kp["e_bmv"],
        kp["d_w1"], kp["d_b1"], kp["d_w2"], kp["d_b2"],
        kp["d_w3"], kp["d_b3"],
    )

    def row_spec(cols):
        return pl.BlockSpec((BM, cols), lambda i: (i, 0))

    def resident_spec(shape):
        # grid-invariant weights/biases: full array, constant block index
        return pl.BlockSpec(shape, lambda i: (0, 0))

    in_specs = [row_spec(Dp), row_spec(Lp)] + [
        resident_spec(a.shape) for a in ordered[2:]
    ]
    out_specs = (row_spec(2 * Lp), row_spec(Dp))
    out_shape = (
        jax.ShapeDtypeStruct((Bp, 2 * Lp), jnp.float32),  # [mean | log_var]
        jax.ShapeDtypeStruct((Bp, Dp), jnp.float32),      # reconstruction
    )

    # Advisory cost hint for XLA scheduling.
    flops = 2 * Bp * (Dp * Hp + Hp * Hp + Hp * 2 * Lp
                      + Lp * Hp + Hp * Hp + Hp * Dp)
    transcendentals = Bp * (Lp + Dp)          # exp(0.5*logvar) + exp(sigmoid)
    bytes_in = sum(int(a.size) * a.dtype.itemsize for a in ordered)
    bytes_out = Bp * 2 * Lp * 4 + Bp * Dp * 4

    mv, rec = pl.pallas_call(
        vae_kernel,
        out_shape=out_shape,
        grid=(Bp // BM,),
        in_specs=in_specs,
        out_specs=out_specs,
        compiler_params=pltpu.CompilerParams(
            # batch axis is embarrassingly parallel -> shards across the two
            # TensorCores on v7x; harmless on v5e/v6e.
            dimension_semantics=("parallel",),
        ),
        cost_estimate=pl.CostEstimate(
            flops=flops,
            transcendentals=transcendentals,
            bytes_accessed=bytes_in + bytes_out,
        ),
    )(*ordered)

    mean = mv[:B, :L]
    log_var = mv[:B, Lp:Lp + L]
    output = rec[:B, :D]
    return mean, log_var, output


# ----------------------------------------------------------------------------
# Parameter construction
# ----------------------------------------------------------------------------
def _linear_init(key, fan_in, fan_out):
    """PyTorch-like U(-1/sqrt(fan_in), 1/sqrt(fan_in)); W stored [in, out]."""
    kw, kb = jax.random.split(key)
    bound = 1.0 / jnp.sqrt(fan_in)
    w = jax.random.uniform(kw, (fan_in, fan_out), jnp.float32, -bound, bound)
    b = jax.random.uniform(kb, (1, fan_out), jnp.float32, -bound, bound)
    return w, b


def init_params(key, input_dim, hidden_dim, latent_dim):
    keys = jax.random.split(key, 7)
    p = {}
    # Encoder
    p["e_w1"], p["e_b1"] = _linear_init(keys[0], input_dim, hidden_dim)
    p["e_w2"], p["e_b2"] = _linear_init(keys[1], hidden_dim, hidden_dim)
    p["e_wm"], p["e_bm"] = _linear_init(keys[2], hidden_dim, latent_dim)
    p["e_wv"], p["e_bv"] = _linear_init(keys[3], hidden_dim, latent_dim)
    # Decoder
    p["d_w1"], p["d_b1"] = _linear_init(keys[4], latent_dim, hidden_dim)
    p["d_w2"], p["d_b2"] = _linear_init(keys[5], hidden_dim, hidden_dim)
    p["d_w3"], p["d_b3"] = _linear_init(keys[6], hidden_dim, input_dim)
    return p


def prepare_kernel_params(p, lane=128):
    """Zero-pad feature dims to lane multiples, fuse the mean/logvar head,
    and cast weights to bf16 for the MXU (biases stay f32)."""
    D, H = p["e_w1"].shape
    L = p["e_wm"].shape[1]
    Dp, Hp, Lp = _round_up(D, lane), _round_up(H, lane), _round_up(L, lane)

    def pad_w(w, rp, cp):
        r, c = w.shape
        return jnp.pad(w, ((0, rp - r), (0, cp - c))).astype(jnp.bfloat16)

    def pad_b(b, cp):
        return jnp.pad(b, ((0, 0), (0, cp - b.shape[1]))).astype(jnp.float32)

    kp = {}
    kp["e_w1"], kp["e_b1"] = pad_w(p["e_w1"], Dp, Hp), pad_b(p["e_b1"], Hp)
    kp["e_w2"], kp["e_b2"] = pad_w(p["e_w2"], Hp, Hp), pad_b(p["e_b2"], Hp)
    # fused [Hp, 2*Lp] head: mean weights in cols [0,Lp), logvar in [Lp,2Lp)
    wm = jnp.pad(p["e_wm"], ((0, Hp - H), (0, Lp - L)))
    wv = jnp.pad(p["e_wv"], ((0, Hp - H), (0, Lp - L)))
    kp["e_wmv"] = jnp.concatenate([wm, wv], axis=1).astype(jnp.bfloat16)
    bm = jnp.pad(p["e_bm"], ((0, 0), (0, Lp - L)))
    bv = jnp.pad(p["e_bv"], ((0, 0), (0, Lp - L)))
    kp["e_bmv"] = jnp.concatenate([bm, bv], axis=1).astype(jnp.float32)
    kp["d_w1"], kp["d_b1"] = pad_w(p["d_w1"], Lp, Hp), pad_b(p["d_b1"], Hp)
    kp["d_w2"], kp["d_b2"] = pad_w(p["d_w2"], Hp, Hp), pad_b(p["d_b2"], Hp)
    kp["d_w3"], kp["d_b3"] = pad_w(p["d_w3"], Hp, Dp), pad_b(p["d_b3"], Dp)
    return kp, (Dp, Hp, Lp)


# ----------------------------------------------------------------------------
# Pure-JAX reference (same bf16 matmul / f32 elementwise recipe as the kernel)
# ----------------------------------------------------------------------------
def ref_forward(x, eps, p):
    act = lambda h: jnp.where(h > 0, h, 0.15 * h)
    bf = lambda a: a.astype(jnp.bfloat16)
    dot = lambda a, w: jnp.dot(bf(a), bf(w), preferred_element_type=jnp.float32)
    h = act(dot(x, p["e_w1"]) + p["e_b1"])
    h = act(dot(h, p["e_w2"]) + p["e_b2"])
    m = dot(h, p["e_wm"]) + p["e_bm"]
    lv = dot(h, p["e_wv"]) + p["e_bv"]
    z = m + jnp.exp(0.5 * lv) * eps
    d = act(dot(z, p["d_w1"]) + p["d_b1"])
    d = act(dot(d, p["d_w2"]) + p["d_b2"])
    o = dot(d, p["d_w3"]) + p["d_b3"]
    return m, lv, 1.0 / (1.0 + jnp.exp(-o))


if __name__ == "__main__":
    # Small shapes; B=256 so the batch grid has 2 steps (BM=128).
    B, INPUT_DIM, HIDDEN_DIM, LATENT_DIM = 256, 64, 32, 16

    root = jax.random.PRNGKey(0)
    k_params, k_x, k_eps = jax.random.split(root, 3)

    params = init_params(k_params, INPUT_DIM, HIDDEN_DIM, LATENT_DIM)
    kernel_params, _ = prepare_kernel_params(params)

    x = jax.random.normal(k_x, (B, INPUT_DIM), jnp.float32)
    # epsilon for reparameterisation (torch.randn_like equivalent, explicit
    # input so the kernel stays deterministic / functional)
    eps = jax.random.normal(k_eps, (B, LATENT_DIM), jnp.float32)

    mean, log_var, output = vae_forward(x, eps, kernel_params)
    jax.block_until_ready((mean, log_var, output))

    rm, rlv, ro = ref_forward(x, eps, params)
    assert mean.shape == (B, LATENT_DIM) and log_var.shape == (B, LATENT_DIM)
    assert output.shape == (B, INPUT_DIM)
    assert jnp.allclose(mean, rm, atol=2e-3), float(jnp.abs(mean - rm).max())
    assert jnp.allclose(log_var, rlv, atol=2e-3), float(jnp.abs(log_var - rlv).max())
    # output tolerance covers the approximate (EUP) reciprocal in the sigmoid
    assert jnp.allclose(output, ro, atol=5e-3), float(jnp.abs(output - ro).max())

    print("KERNEL_OK")
</pallas_src>

<mosaic_0001>
module attributes {stable_mosaic.version = 11 : i64} {
  func.func @vae_kernel(%arg0: i32, %arg1: memref<128x128xbf16, #tpu.memory_space<vmem>>, %arg2: memref<128x128xf32, #tpu.memory_space<vmem>>, %arg3: memref<128x128xbf16, #tpu.memory_space<vmem>>, %arg4: memref<1x128xf32, #tpu.memory_space<vmem>>, %arg5: memref<128x128xbf16, #tpu.memory_space<vmem>>, %arg6: memref<1x128xf32, #tpu.memory_space<vmem>>, %arg7: memref<128x256xbf16, #tpu.memory_space<vmem>>, %arg8: memref<1x256xf32, #tpu.memory_space<vmem>>, %arg9: memref<128x128xbf16, #tpu.memory_space<vmem>>, %arg10: memref<1x128xf32, #tpu.memory_space<vmem>>, %arg11: memref<128x128xbf16, #tpu.memory_space<vmem>>, %arg12: memref<1x128xf32, #tpu.memory_space<vmem>>, %arg13: memref<128x128xbf16, #tpu.memory_space<vmem>>, %arg14: memref<1x128xf32, #tpu.memory_space<vmem>>, %arg15: memref<128x256xf32, #tpu.memory_space<vmem>>, %arg16: memref<128x128xf32, #tpu.memory_space<vmem>>) attributes {dimension_semantics = [#tpu.dimension_semantics<parallel>], iteration_bounds = array<i64: 2>, scalar_prefetch = 0 : i64, scratch_operands = 0 : i64, tpu.core_type = #tpu.core_type<tc>, window_params = [{transform_indices = @transform_0, window_bounds = array<i64: 128, 128>}, {transform_indices = @transform_1, window_bounds = array<i64: 128, 128>}, {pipeline_mode = #tpu.pipeline_mode<synchronous>, transform_indices = @transform_2, window_bounds = array<i64: 128, 128>}, {pipeline_mode = #tpu.pipeline_mode<synchronous>, transform_indices = @transform_3, window_bounds = array<i64: 1, 128>}, {pipeline_mode = #tpu.pipeline_mode<synchronous>, transform_indices = @transform_4, window_bounds = array<i64: 128, 128>}, {pipeline_mode = #tpu.pipeline_mode<synchronous>, transform_indices = @transform_5, window_bounds = array<i64: 1, 128>}, {pipeline_mode = #tpu.pipeline_mode<synchronous>, transform_indices = @transform_6, window_bounds = array<i64: 128, 256>}, {pipeline_mode = #tpu.pipeline_mode<synchronous>, transform_indices = @transform_7, window_bounds = array<i64: 1, 256>}, {pipeline_mode = #tpu.pipeline_mode<synchronous>, transform_indices = @transform_8, window_bounds = array<i64: 128, 128>}, {pipeline_mode = #tpu.pipeline_mode<synchronous>, transform_indices = @transform_9, window_bounds = array<i64: 1, 128>}, {pipeline_mode = #tpu.pipeline_mode<synchronous>, transform_indices = @transform_10, window_bounds = array<i64: 128, 128>}, {pipeline_mode = #tpu.pipeline_mode<synchronous>, transform_indices = @transform_11, window_bounds = array<i64: 1, 128>}, {pipeline_mode = #tpu.pipeline_mode<synchronous>, transform_indices = @transform_12, window_bounds = array<i64: 128, 128>}, {pipeline_mode = #tpu.pipeline_mode<synchronous>, transform_indices = @transform_13, window_bounds = array<i64: 1, 128>}, {transform_indices = @transform_14, window_bounds = array<i64: 128, 256>}, {transform_indices = @transform_15, window_bounds = array<i64: 128, 128>}]} {
    %c0 = arith.constant 0 : index
    %c0_0 = arith.constant 0 : index
    %0 = vector.load %arg1[%c0, %c0_0] : memref<128x128xbf16, #tpu.memory_space<vmem>>, vector<128x128xbf16>
    %c0_1 = arith.constant 0 : index
    %c0_2 = arith.constant 0 : index
    %1 = vector.load %arg3[%c0_1, %c0_2] : memref<128x128xbf16, #tpu.memory_space<vmem>>, vector<128x128xbf16>
    %cst = arith.constant dense<0.000000e+00> : vector<128x128xf32>
    %2 = tpu.matmul %0, %1, %cst {dimension_numbers = #tpu.dot_dimension_numbers<[1], [0], [0], [1], [0, 0, 1, 1], [], []>} : vector<128x128xbf16>, vector<128x128xbf16>, vector<128x128xf32> -> vector<128x128xf32>
    %c0_3 = arith.constant 0 : index
    %c0_4 = arith.constant 0 : index
    %3 = vector.load %arg4[%c0_3, %c0_4] : memref<1x128xf32, #tpu.memory_space<vmem>>, vector<1x128xf32>
    %4 = vector.broadcast %3 : vector<1x128xf32> to vector<128x128xf32>
    %5 = arith.addf %2, %4 : vector<128x128xf32>
    %cst_5 = arith.constant 0.000000e+00 : f32
    %6 = vector.broadcast %cst_5 : f32 to vector<128x128xf32>
    %7 = arith.cmpf ogt, %5, %6 : vector<128x128xf32>
    %cst_6 = arith.constant 1.500000e-01 : f32
    %8 = vector.broadcast %cst_6 : f32 to vector<128x128xf32>
    %9 = arith.mulf %8, %5 : vector<128x128xf32>
    %10 = arith.select %7, %5, %9 : vector<128x128xi1>, vector<128x128xf32>
    %11 = arith.truncf %10 : vector<128x128xf32> to vector<128x128xbf16>
    %c0_7 = arith.constant 0 : index
    %c0_8 = arith.constant 0 : index
    %12 = vector.load %arg5[%c0_7, %c0_8] : memref<128x128xbf16, #tpu.memory_space<vmem>>, vector<128x128xbf16>
    %cst_9 = arith.constant dense<0.000000e+00> : vector<128x128xf32>
    %13 = tpu.matmul %11, %12, %cst_9 {dimension_numbers = #tpu.dot_dimension_numbers<[1], [0], [0], [1], [0, 0, 1, 1], [], []>} : vector<128x128xbf16>, vector<128x128xbf16>, vector<128x128xf32> -> vector<128x128xf32>
    %c0_10 = arith.constant 0 : index
    %c0_11 = arith.constant 0 : index
    %14 = vector.load %arg6[%c0_10, %c0_11] : memref<1x128xf32, #tpu.memory_space<vmem>>, vector<1x128xf32>
    %15 = vector.broadcast %14 : vector<1x128xf32> to vector<128x128xf32>
    %16 = arith.addf %13, %15 : vector<128x128xf32>
    %cst_12 = arith.constant 0.000000e+00 : f32
    %17 = vector.broadcast %cst_12 : f32 to vector<128x128xf32>
    %18 = arith.cmpf ogt, %16, %17 : vector<128x128xf32>
    %cst_13 = arith.constant 1.500000e-01 : f32
    %19 = vector.broadcast %cst_13 : f32 to vector<128x128xf32>
    %20 = arith.mulf %19, %16 : vector<128x128xf32>
    %21 = arith.select %18, %16, %20 : vector<128x128xi1>, vector<128x128xf32>
    %22 = arith.truncf %21 : vector<128x128xf32> to vector<128x128xbf16>
    %c0_14 = arith.constant 0 : index
    %c0_15 = arith.constant 0 : index
    %23 = vector.load %arg7[%c0_14, %c0_15] : memref<128x256xbf16, #tpu.memory_space<vmem>>, vector<128x256xbf16>
    %cst_16 = arith.constant dense<0.000000e+00> : vector<128x256xf32>
    %24 = tpu.matmul %22, %23, %cst_16 {dimension_numbers = #tpu.dot_dimension_numbers<[1], [0], [0], [1], [0, 0, 1, 1], [], []>} : vector<128x128xbf16>, vector<128x256xbf16>, vector<128x256xf32> -> vector<128x256xf32>
    %c0_17 = arith.constant 0 : index
    %c0_18 = arith.constant 0 : index
    %25 = vector.load %arg8[%c0_17, %c0_18] : memref<1x256xf32, #tpu.memory_space<vmem>>, vector<1x256xf32>
    %26 = vector.broadcast %25 : vector<1x256xf32> to vector<128x256xf32>
    %27 = arith.addf %24, %26 : vector<128x256xf32>
    %28 = vector.extract_strided_slice %27 {offsets = [0, 0], sizes = [128, 128], strides = [1, 1]} : vector<128x256xf32> to vector<128x128xf32>
    %29 = vector.extract_strided_slice %27 {offsets = [0, 128], sizes = [128, 128], strides = [1, 1]} : vector<128x256xf32> to vector<128x128xf32>
    %cst_19 = arith.constant 5.000000e-01 : f32
    %30 = vector.broadcast %cst_19 : f32 to vector<128x128xf32>
    %31 = arith.mulf %30, %29 : vector<128x128xf32>
    %32 = math.exp %31 : vector<128x128xf32>
    %c0_20 = arith.constant 0 : index
    %c0_21 = arith.constant 0 : index
    %33 = vector.load %arg2[%c0_20, %c0_21] : memref<128x128xf32, #tpu.memory_space<vmem>>, vector<128x128xf32>
    %34 = arith.mulf %32, %33 : vector<128x128xf32>
    %35 = arith.addf %28, %34 : vector<128x128xf32>
    %36 = arith.truncf %35 : vector<128x128xf32> to vector<128x128xbf16>
    %c0_22 = arith.constant 0 : index
    %c0_23 = arith.constant 0 : index
    %37 = vector.load %arg9[%c0_22, %c0_23] : memref<128x128xbf16, #tpu.memory_space<vmem>>, vector<128x128xbf16>
    %cst_24 = arith.constant dense<0.000000e+00> : vector<128x128xf32>
    %38 = tpu.matmul %36, %37, %cst_24 {dimension_numbers = #tpu.dot_dimension_numbers<[1], [0], [0], [1], [0, 0, 1, 1], [], []>} : vector<128x128xbf16>, vector<128x128xbf16>, vector<128x128xf32> -> vector<128x128xf32>
    %c0_25 = arith.constant 0 : index
    %c0_26 = arith.constant 0 : index
    %39 = vector.load %arg10[%c0_25, %c0_26] : memref<1x128xf32, #tpu.memory_space<vmem>>, vector<1x128xf32>
    %40 = vector.broadcast %39 : vector<1x128xf32> to vector<128x128xf32>
    %41 = arith.addf %38, %40 : vector<128x128xf32>
    %cst_27 = arith.constant 0.000000e+00 : f32
    %42 = vector.broadcast %cst_27 : f32 to vector<128x128xf32>
    %43 = arith.cmpf ogt, %41, %42 : vector<128x128xf32>
    %cst_28 = arith.constant 1.500000e-01 : f32
    %44 = vector.broadcast %cst_28 : f32 to vector<128x128xf32>
    %45 = arith.mulf %44, %41 : vector<128x128xf32>
    %46 = arith.select %43, %41, %45 : vector<128x128xi1>, vector<128x128xf32>
    %47 = arith.truncf %46 : vector<128x128xf32> to vector<128x128xbf16>
    %c0_29 = arith.constant 0 : index
    %c0_30 = arith.constant 0 : index
    %48 = vector.load %arg11[%c0_29, %c0_30] : memref<128x128xbf16, #tpu.memory_space<vmem>>, vector<128x128xbf16>
    %cst_31 = arith.constant dense<0.000000e+00> : vector<128x128xf32>
    %49 = tpu.matmul %47, %48, %cst_31 {dimension_numbers = #tpu.dot_dimension_numbers<[1], [0], [0], [1], [0, 0, 1, 1], [], []>} : vector<128x128xbf16>, vector<128x128xbf16>, vector<128x128xf32> -> vector<128x128xf32>
    %c0_32 = arith.constant 0 : index
    %c0_33 = arith.constant 0 : index
    %50 = vector.load %arg12[%c0_32, %c0_33] : memref<1x128xf32, #tpu.memory_space<vmem>>, vector<1x128xf32>
    %51 = vector.broadcast %50 : vector<1x128xf32> to vector<128x128xf32>
    %52 = arith.addf %49, %51 : vector<128x128xf32>
    %cst_34 = arith.constant 0.000000e+00 : f32
    %53 = vector.broadcast %cst_34 : f32 to vector<128x128xf32>
    %54 = arith.cmpf ogt, %52, %53 : vector<128x128xf32>
    %cst_35 = arith.constant 1.500000e-01 : f32
    %55 = vector.broadcast %cst_35 : f32 to vector<128x128xf32>
    %56 = arith.mulf %55, %52 : vector<128x128xf32>
    %57 = arith.select %54, %52, %56 : vector<128x128xi1>, vector<128x128xf32>
    %58 = arith.truncf %57 : vector<128x128xf32> to vector<128x128xbf16>
    %c0_36 = arith.constant 0 : index
    %c0_37 = arith.constant 0 : index
    %59 = vector.load %arg13[%c0_36, %c0_37] : memref<128x128xbf16, #tpu.memory_space<vmem>>, vector<128x128xbf16>
    %cst_38 = arith.constant dense<0.000000e+00> : vector<128x128xf32>
    %60 = tpu.matmul %58, %59, %cst_38 {dimension_numbers = #tpu.dot_dimension_numbers<[1], [0], [0], [1], [0, 0, 1, 1], [], []>} : vector<128x128xbf16>, vector<128x128xbf16>, vector<128x128xf32> -> vector<128x128xf32>
    %c0_39 = arith.constant 0 : index
    %c0_40 = arith.constant 0 : index
    %61 = vector.load %arg14[%c0_39, %c0_40] : memref<1x128xf32, #tpu.memory_space<vmem>>, vector<1x128xf32>
    %62 = vector.broadcast %61 : vector<1x128xf32> to vector<128x128xf32>
    %63 = arith.addf %60, %62 : vector<128x128xf32>
    %cst_41 = arith.constant 0.000000e+00 : f32
    %64 = vector.broadcast %cst_41 : f32 to vector<128x128xf32>
    %65 = arith.subf %64, %63 : vector<128x128xf32>
    %66 = math.exp %65 : vector<128x128xf32>
    %cst_42 = arith.constant 1.000000e+00 : f32
    %67 = vector.broadcast %cst_42 : f32 to vector<128x128xf32>
    %68 = arith.addf %67, %66 : vector<128x128xf32>
    %69 = tpu.reciprocal %68 {approx = true} : vector<128x128xf32> -> vector<128x128xf32>
    %c0_43 = arith.constant 0 : index
    %c0_44 = arith.constant 0 : index
    %70 = vector.load %arg15[%c0_43, %c0_44] : memref<128x256xf32, #tpu.memory_space<vmem>>, vector<128x256xf32>
    tpu.vector_store %arg15[%c0_43, %c0_44], %27 {strides = array<i32>} : memref<128x256xf32, #tpu.memory_space<vmem>>, vector<128x256xf32>,
    %c0_45 = arith.constant 0 : index
    %c0_46 = arith.constant 0 : index
    %71 = vector.load %arg16[%c0_45, %c0_46] : memref<128x128xf32, #tpu.memory_space<vmem>>, vector<128x128xf32>
    tpu.vector_store %arg16[%c0_45, %c0_46], %69 {strides = array<i32>} : memref<128x128xf32, #tpu.memory_space<vmem>>, vector<128x128xf32>,
    return
  }
  func.func @transform_0(%arg0: i32) -> (i32, i32) {
    %c0_i32 = arith.constant 0 : i32
    %c0_i32_0 = arith.constant 0 : i32
    return %arg0, %c0_i32 : i32, i32
  }
  func.func @transform_1(%arg0: i32) -> (i32, i32) {
    %c0_i32 = arith.constant 0 : i32
    %c0_i32_0 = arith.constant 0 : i32
    return %arg0, %c0_i32 : i32, i32
  }
  func.func @transform_2(%arg0: i32) -> (i32, i32) {
    %c0_i32 = arith.constant 0 : i32
    %c0_i32_0 = arith.constant 0 : i32
    %c0_i32_1 = arith.constant 0 : i32
    return %c0_i32, %c0_i32_0 : i32, i32
  }
  func.func @transform_3(%arg0: i32) -> (i32, i32) {
    %c0_i32 = arith.constant 0 : i32
    %c0_i32_0 = arith.constant 0 : i32
    %c0_i32_1 = arith.constant 0 : i32
    return %c0_i32, %c0_i32_0 : i32, i32
  }
  func.func @transform_4(%arg0: i32) -> (i32, i32) {
    %c0_i32 = arith.constant 0 : i32
    %c0_i32_0 = arith.constant 0 : i32
    %c0_i32_1 = arith.constant 0 : i32
    return %c0_i32, %c0_i32_0 : i32, i32
  }
  func.func @transform_5(%arg0: i32) -> (i32, i32) {
    %c0_i32 = arith.constant 0 : i32
    %c0_i32_0 = arith.constant 0 : i32
    %c0_i32_1 = arith.constant 0 : i32
    return %c0_i32, %c0_i32_0 : i32, i32
  }
  func.func @transform_6(%arg0: i32) -> (i32, i32) {
    %c0_i32 = arith.constant 0 : i32
    %c0_i32_0 = arith.constant 0 : i32
    %c0_i32_1 = arith.constant 0 : i32
    return %c0_i32, %c0_i32_0 : i32, i32
  }
  func.func @transform_7(%arg0: i32) -> (i32, i32) {
    %c0_i32 = arith.constant 0 : i32
    %c0_i32_0 = arith.constant 0 : i32
    %c0_i32_1 = arith.constant 0 : i32
    return %c0_i32, %c0_i32_0 : i32, i32
  }
  func.func @transform_8(%arg0: i32) -> (i32, i32) {
    %c0_i32 = arith.constant 0 : i32
    %c0_i32_0 = arith.constant 0 : i32
    %c0_i32_1 = arith.constant 0 : i32
    return %c0_i32, %c0_i32_0 : i32, i32
  }
  func.func @transform_9(%arg0: i32) -> (i32, i32) {
    %c0_i32 = arith.constant 0 : i32
    %c0_i32_0 = arith.constant 0 : i32
    %c0_i32_1 = arith.constant 0 : i32
    return %c0_i32, %c0_i32_0 : i32, i32
  }
  func.func @transform_10(%arg0: i32) -> (i32, i32) {
    %c0_i32 = arith.constant 0 : i32
    %c0_i32_0 = arith.constant 0 : i32
    %c0_i32_1 = arith.constant 0 : i32
    return %c0_i32, %c0_i32_0 : i32, i32
  }
  func.func @transform_11(%arg0: i32) -> (i32, i32) {
    %c0_i32 = arith.constant 0 : i32
    %c0_i32_0 = arith.constant 0 : i32
    %c0_i32_1 = arith.constant 0 : i32
    return %c0_i32, %c0_i32_0 : i32, i32
  }
  func.func @transform_12(%arg0: i32) -> (i32, i32) {
    %c0_i32 = arith.constant 0 : i32
    %c0_i32_0 = arith.constant 0 : i32
    %c0_i32_1 = arith.constant 0 : i32
    return %c0_i32, %c0_i32_0 : i32, i32
  }
  func.func @transform_13(%arg0: i32) -> (i32, i32) {
    %c0_i32 = arith.constant 0 : i32
    %c0_i32_0 = arith.constant 0 : i32
    %c0_i32_1 = arith.constant 0 : i32
    return %c0_i32, %c0_i32_0 : i32, i32
  }
  func.func @transform_14(%arg0: i32) -> (i32, i32) {
    %c0_i32 = arith.constant 0 : i32
    %c0_i32_0 = arith.constant 0 : i32
    return %arg0, %c0_i32 : i32, i32
  }
  func.func @transform_15(%arg0: i32) -> (i32, i32) {
    %c0_i32 = arith.constant 0 : i32
    %c0_i32_0 = arith.constant 0 : i32
    return %arg0, %c0_i32 : i32, i32
  }
}

</mosaic_0001>

<bundles_post_ra>
// kernel: vae_forward.1
= control target key start
LH: loop header
LB: loop body
LE: loop exit
PB: predicated region body
PF: predicated region fallthrough
CT: control target
= control target key end

     0   :  { %s2830_s18 = smov 0   ;;  %s3310_s0 = inlined_call_operand.vmem [shape: bf16[256,128], index: 0, kind: input, shape index: {}]   ;;  %s3311_s1 = inlined_call_operand.vmem [shape: f32[256,128], index: 1, kind: input, shape index: {}]   ;;  %s3312_s2 = inlined_call_operand.vmem [shape: bf16[128,128], index: 2, kind: input, shape index: {}]   ;;  %s3313_s3 = inlined_call_operand.vmem [shape: f32[1,128], index: 3, kind: input, shape index: {}]   ;;  %s3314_s4 = inlined_call_operand.vmem [shape: bf16[128,128], index: 4, kind: input, shape index: {}]   ;;  %s3315_s5 = inlined_call_operand.vmem [shape: f32[1,128], index: 5, kind: input, shape index: {}]   ;;  %s3316_s6 = inlined_call_operand.vmem [shape: bf16[128,256], index: 6, kind: input, shape index: {}]   ;;  %s3317_s7 = inlined_call_operand.vmem [shape: f32[1,256], index: 7, kind: input, shape index: {}]   ;;  %s3318_s8 = inlined_call_operand.vmem [shape: bf16[128,128], index: 8, kind: input, shape index: {}]   ;;  %s3319_s9 = inlined_call_operand.vmem [shape: f32[1,128], index: 9, kind: input, shape index: {}]   ;;  %s3320_s10 = inlined_call_operand.vmem [shape: bf16[128,128], index: 10, kind: input, shape index: {}]   ;;  %s3321_s11 = inlined_call_operand.vmem [shape: f32[1,128], index: 11, kind: input, shape index: {}]   ;;  %s3322_s12 = inlined_call_operand.vmem [shape: bf16[128,128], index: 12, kind: input, shape index: {}]   ;;  %s3323_s13 = inlined_call_operand.vmem [shape: f32[1,128], index: 13, kind: input, shape index: {}]   ;;  %s3324_s14 = inlined_call_operand.vmem [shape: f32[256,256], index: 14, kind: output, shape index: {0}]   ;;  %s3325_s15 = inlined_call_operand.vmem [shape: f32[256,128], index: 15, kind: output, shape index: {1}]  }
   0x1 LB: > { %s2222_s19 = sadd.s32 4294967295, %s2747_s18   ;;  %p2226_p0 = scmp.ge.s32.totalorder %s2747_s18, 1  ;;  %s2747_s18 = sphi %s2830_s18, %s26_s18  }
   0x2   : > { %p452_p1 = scmp.lt.s32.totalorder %s2747_s18, 3 }
   0x4   : > { %p453_p2 = pnand %p2226_p0, %p452_p1 }
   0x5   : > { %v2573_v0 = vld [vmem:[%s3312_s2] sm:$0xff] (!%p453_p2)   ;;  %s2227_s22 = sshll.u32 (!%p453_p2), %s2222_s19, 4  ;;  %v2574_v1 = vld [vmem:[%s3312_s2 + $0x8] sm:$0xff] (!%p453_p2)   ;;  %v2575_v2 = vld [vmem:[%s3312_s2 + $0x10] sm:$0xff] (!%p453_p2)  }
   0x6   : > { %456 = sbr.rel (%p453_p2) target bundleno = 1472 (0x5c0), region = 76  ;;  %p512_p3 = scmp.lt.s32.totalorder (!%p453_p2), %s2227_s22, 31  ;;  %2388 = vmatprep.subr.bf16.mxu0 (!%p453_p2), %v2573_v0  ;;  %v2576_v3 = vld [vmem:[%s3312_s2 + $0x18] sm:$0xff] (!%p453_p2)   ;;  %v2577_v5 = vld [vmem:[%s3312_s2 + $0x20] sm:$0xff] (!%p453_p2)   ;;  %v2578_v6 = vld [vmem:[%s3312_s2 + $0x28] sm:$0xff] (!%p453_p2)  }
   0x7   : > { %2389 = vmatpush3.bf16.msra.mxu0 (!%p453_p2), %v2573_v0  ;;  %v2589_v7 = vld [vmem:[%s3314_s4] sm:$0xff] (!%p453_p2)   ;;  %v2590_v8 = vld [vmem:[%s3314_s4 + $0x8] sm:$0xff] (!%p453_p2)   ;;  %v2579_v9 = vld [vmem:[%s3312_s2 + $0x30] sm:$0xff] (!%p453_p2)  }
   0x8   : > { %2390 = vmatprep.subr.bf16.mxu0 (!%p453_p2), %v2574_v1  ;;  %2420 = vmatprep.subr.bf16.mxu1 (!%p453_p2), %v2589_v7  ;;  %v2591_v10 = vld [vmem:[%s3314_s4 + $0x10] sm:$0xff] (!%p453_p2)   ;;  %v2580_v11 = vld [vmem:[%s3312_s2 + $0x38] sm:$0xff] (!%p453_p2)   ;;  %v2593_v13 = vld [vmem:[%s3314_s4 + $0x20] sm:$0xff] (!%p453_p2)  }
   0x9   : > { %2421 = vmatpush3.bf16.msra.mxu1 (!%p453_p2), %v2589_v7  ;;  %v2592_v12 = vld [vmem:[%s3314_s4 + $0x18] sm:$0xff] (!%p453_p2)   ;;  %v2594_v21 = vld [vmem:[%s3314_s4 + $0x28] sm:$0xff] (!%p453_p2)   ;;  %v2595_v22 = vld [vmem:[%s3314_s4 + $0x30] sm:$0xff] (!%p453_p2)  }
   0xa   : > { %2422 = vmatprep.subr.bf16.mxu1 (!%p453_p2), %v2590_v8  ;;  %v2596_v23 = vld [vmem:[%s3314_s4 + $0x38] sm:$0xff] (!%p453_p2)   ;;  %v2597_v24 = vld [vmem:[%s3316_s6] ss:$8 sps:$4 sm:$0xff] (!%p453_p2)   ;;  %v2599_v25 = vld [vmem:[%s3316_s6 + $0x4] ss:$8 sps:$4 sm:$0xff] (!%p453_p2)  }
   0xb   : > { %2391 = vmatpush3.bf16.msra.mxu0 (!%p453_p2), %v2574_v1  ;;  %v2602_v26 = vld [vmem:[%s3316_s6 + $0x14] ss:$8 sps:$4 sm:$0xff] (!%p453_p2)   ;;  %v2600_v27 = vld [vmem:[%s3316_s6 + $0x10] ss:$8 sps:$4 sm:$0xff] (!%p453_p2)   ;;  %v2605_v28 = vld [vmem:[%s3316_s6 + $0x24] ss:$8 sps:$4 sm:$0xff] (!%p453_p2)  }
   0xc   : > { %2392 = vmatprep.subr.bf16.mxu0 (!%p453_p2), %v2575_v2  ;;  %v2603_v29 = vld [vmem:[%s3316_s6 + $0x20] ss:$8 sps:$4 sm:$0xff] (!%p453_p2)   ;;  %v2608_v30 = vld [vmem:[%s3316_s6 + $0x34] ss:$8 sps:$4 sm:$0xff] (!%p453_p2)   ;;  %v2606_v31 = vld [vmem:[%s3316_s6 + $0x30] ss:$8 sps:$4 sm:$0xff] (!%p453_p2)  }
   0xd   : > { %s3327_s22 = smov (!%p512_p3, %s2227_s22), 31  ;;  %2423 = vmatpush3.bf16.msra.mxu1 %v2590_v8  ;;  %v2611_v32 = vld [vmem:[%s3316_s6 + $0x44] ss:$8 sps:$4 sm:$0xff]   ;;  %v2609_v33 = vld [vmem:[%s3316_s6 + $0x40] ss:$8 sps:$4 sm:$0xff]  }
   0xe   : > { %s2228_s27 = sshll.u32 %s3327_s22, 2  ;;  %2424 = vmatprep.subr.bf16.mxu1 %v2591_v10  ;;  %v2614_v34 = vld [vmem:[%s3316_s6 + $0x54] ss:$8 sps:$4 sm:$0xff]   ;;  %v2612_v35 = vld [vmem:[%s3316_s6 + $0x50] ss:$8 sps:$4 sm:$0xff]   ;;  %s2307_s23 = sshll.u32 %s3327_s22, 4 }
   0xf   : > { %s2853_s30 = scalar_lea.vmem %s3310_s0, %s2228_s27  ;;  %2393 = vmatpush3.bf16.msra.mxu0 %v2575_v2  ;;  %v2941_v36 = vld [vmem:[%s3313_s3] ss:$0 sm:$0xff]  ;;  %s3041_s26 = scalar_lea.vmem %s3324_s14, %s2307_s23 }
  0x10   : > { %v2581_v4 = vld [vmem:[%s2853_s30] sm:$0xff]   ;;  %2394 = vmatprep.subr.bf16.mxu0 %v2576_v3  ;;  %v2582_v14 = vld [vmem:[%s2853_s30 + $0x8] sm:$0xff]   ;;  %v2583_v15 = vld [vmem:[%s2853_s30 + $0x10] sm:$0xff]   ;;  %s2230_s27 = sshll.u32 %s3327_s22, 3 }
  0x11   : > { %2404 = vmatprep.mubr.bf16.mxu0 %v2581_v4  ;;  %2425 = vmatpush3.bf16.msra.mxu1 %v2591_v10  ;;  %v2584_v16 = vld [vmem:[%s2853_s30 + $0x18] sm:$0xff]   ;;  %v2585_v17 = vld [vmem:[%s2853_s30 + $0x20] sm:$0xff]   ;;  %v2586_v18 = vld [vmem:[%s2853_s30 + $0x28] sm:$0xff]   ;;  %s3068_s16 = scalar_lea.vmem %s3311_s1, %s2230_s27  ;;  %s3281_s19 = scalar_lea.vmem %s3325_s15, %s2230_s27 }
  0x12   : > { %2426 = vmatprep.subr.bf16.mxu1 %v2592_v12  ;;  %v2587_v19 = vld [vmem:[%s2853_s30 + $0x30] sm:$0xff]   ;;  %v2588_v20 = vld [vmem:[%s2853_s30 + $0x38] sm:$0xff]  }
  0x13   : > { %2395 = vmatpush3.bf16.msra.mxu0 %v2576_v3 }
  0x14   : > { %2396 = vmatprep.subr.bf16.mxu0 %v2577_v5 }
  0x15   : > { %2427 = vmatpush3.bf16.msra.mxu1 %v2592_v12 }
  0x16   : > { %2428 = vmatprep.subr.bf16.mxu1 %v2593_v13 }
  0x17   : > { %2397 = vmatpush3.bf16.msra.mxu0 %v2577_v5 }
  0x18   : > { %2398 = vmatprep.subr.bf16.mxu0 %v2578_v6 }
  0x19   : > { %2429 = vmatpush3.bf16.msra.mxu1 %v2593_v13 }
  0x1a   : > { %2430 = vmatprep.subr.bf16.mxu1 %v2594_v21 }
  0x1b   : > { %2399 = vmatpush3.bf16.msra.mxu0 %v2578_v6 }
  0x1c   : > { %2400 = vmatprep.subr.bf16.mxu0 %v2579_v9 }
  0x1d   : > { %2431 = vmatpush3.bf16.msra.mxu1 %v2594_v21 }
  0x1e   : > { %2432 = vmatprep.subr.bf16.mxu1 %v2595_v22 }
  0x1f   : > { %2401 = vmatpush3.bf16.msra.mxu0 %v2579_v9 }
  0x20   : > { %2402 = vmatprep.subr.bf16.mxu0 %v2580_v11 }
  0x21   : > { %2433 = vmatpush3.bf16.msra.mxu1 %v2595_v22 }
  0x22   : > { %2434 = vmatprep.subr.bf16.mxu1 %v2596_v23 }
  0x23   : > { %2403 = vmatpush3.bf16.msra.mxu0 %v2580_v11 }
  0x24   : > { %1157 = vmatprep.subr.bf16.mxu0 %v2599_v25 }
  0x25   : > { %2435 = vmatpush3.bf16.msra.mxu1 %v2596_v23 }
  0x26   : > { %2405 = vmatmul.mubr.bf16.vlgmr.msra.gmra.mrb[0].mxu0 %v2582_v14 }
  0x27   : > { %2408 = vmatprep.mubr.bf16.mxu0 %v2583_v15  ;;  %1158 = vmatpush1.bf16.msra.mxu0 %v2597_v24 }
  0x28   : > { %1159 = vmatprep.subr.bf16.mxu0 %v2602_v26 }
  0x2b   : > { %1160 = vmatpush1.bf16.msra.mxu0 %v2600_v27 }
  0x2c   : > { %1161 = vmatprep.subr.bf16.mxu0 %v2605_v28 }
  0x2e   : > { %2409 = vmatmul.mubr.bf16.gmra.mrb[4].mxu0 %v2584_v16 }
  0x2f   : > { %2412 = vmatprep.mubr.bf16.mxu0 %v2585_v17  ;;  %1162 = vmatpush1.bf16.msra.mxu0 %v2603_v29 }
  0x30   : > { %1163 = vmatprep.subr.bf16.mxu0 %v2608_v30 }
  0x33   : > { %1164 = vmatpush1.bf16.msra.mxu0 %v2606_v31 }
  0x34   : > { %1165 = vmatprep.subr.bf16.mxu0 %v2611_v32 }
  0x36   : > { %2413 = vmatmul.mubr.bf16.gmra.mrb[8].mxu0 %v2586_v18 }
  0x37   : > { %2416 = vmatprep.mubr.bf16.mxu0 %v2587_v19  ;;  %1166 = vmatpush1.bf16.msra.mxu0 %v2609_v33 }
  0x38   : > { %1167 = vmatprep.subr.bf16.mxu0 %v2614_v34 }
  0x3b   : > { %1168 = vmatpush1.bf16.msra.mxu0 %v2612_v35 }
  0x3e   : > { %2417 = vmatmul.mubr.bf16.gmra.mrb[12].mxu0 %v2588_v20 }
  0xf9   : > { %v2406_v37 = vpop.f32.mrb[0].mxu0 }
  0xfa   : > { %v715_v38 = vadd.f32 %v2406_v37, %v2941_v36  ;;  %v706_v39 = vpop.f32.mrb[1].mxu0 }
  0xfb   : > { %v707_v40 = vadd.f32 %v2941_v36, %v706_v39  ;;  %v2407_v41 = vpop.f32.mrb[2].mxu0 }
  0xfc   : > { %v787_v42 = vmul.f32 0.15, %v715_v38  ;;  %v718_v43 = vadd.f32 %v2407_v41, %v2941_v36  ;;  %v709_v44 = vpop.f32.mrb[3].mxu0  ;;  %vm771_vm0 = vcmp.gt.f32.partialorder %v715_v38, 0.0 }
  0xfd   : > { %v785_v45 = vmul.f32 0.15, %v707_v40  ;;  %v710_v46 = vadd.f32 %v2941_v36, %v709_v44  ;;  %vm769_vm2 = vcmp.gt.f32.partialorder %v707_v40, 0.0 }
  0xfe   : > { %vm772_vm1 = vcmp.gt.f32.partialorder %v718_v43, 0.0  ;;  %v788_v47 = vmul.f32 0.15, %v718_v43  ;;  %v803_v49 = vsel %vm771_vm0, %v715_v38, %v787_v42 }
  0xff   : > { %v786_v48 = vmul.f32 0.15, %v710_v46  ;;  %vm770_vm3 = vcmp.gt.f32.partialorder %v710_v46, 0.0  ;;  %v801_v52 = vsel %vm769_vm2, %v707_v40, %v785_v45 }
 0x100   : > { %v804_v50 = vsel %vm772_vm1, %v718_v43, %v788_v47  ;;  %v2620_v47 = vld [vmem:[%s3316_s6 + $0x74] ss:$8 sps:$4 sm:$0xff]  }
 0x101   : > { %v2410_v51 = vpop.f32.mrb[4].mxu0  ;;  %v802_v53 = vsel %vm770_vm3, %v710_v46, %v786_v48  ;;  %v818_v54 = vpack.c.bf16 %v804_v50, %v803_v49  ;;  %v2617_v46 = vld [vmem:[%s3316_s6 + $0x64] ss:$8 sps:$4 sm:$0xff]   ;;  %v2618_v48 = vld [vmem:[%s3316_s6 + $0x70] ss:$8 sps:$4 sm:$0xff]   ;;  %v2749_v49 = vmov 0  }
 0x102   : > { %v731_v55 = vadd.f32 %v2410_v51, %v2941_v36  ;;  %v722_v56 = vpop.f32.mrb[5].mxu0  ;;  %v817_v57 = vpack.c.bf16 %v802_v53, %v801_v52  ;;  %1169 = vmatprep.subr.bf16.mxu0 %v2617_v46  ;;  %1189 = vmatprep.mubr.bf16.mxu0 %v2749_v49  ;;  %v2975_v50 = vld [vmem:[%s3315_s5] ss:$0 sm:$0xff] }
 0x103   : > { %v723_v58 = vadd.f32 %v2941_v36, %v722_v56  ;;  %v2411_v59 = vpop.f32.mrb[6].mxu0 }
 0x104   : > { %vm775_vm4 = vcmp.gt.f32.partialorder %v731_v55, 0.0  ;;  %v791_v60 = vmul.f32 0.15, %v731_v55  ;;  %v734_v61 = vadd.f32 %v2411_v59, %v2941_v36  ;;  %v725_v62 = vpop.f32.mrb[7].mxu0  ;;  %2436 = vmatprep.mubr.bf16.mxu1 %v817_v57 }
 0x105   : > { %vm773_vm5 = vcmp.gt.f32.partialorder %v723_v58, 0.0  ;;  %v789_v63 = vmul.f32 0.15, %v723_v58  ;;  %v726_v0 = vadd.f32 %v2941_v36, %v725_v62  ;;  %2437 = vmatmul.mubr.bf16.vlgmr.msra.gmra.mrb[0].mxu1 %v818_v54 }
 0x106   : > { %vm776_vm6 = vcmp.gt.f32.partialorder %v734_v61, 0.0  ;;  %v792_v1 = vmul.f32 0.15, %v734_v61  ;;  %v807_v2 = vsel %vm775_vm4, %v731_v55, %v791_v60 }
 0x107   : > { %vm774_vm7 = vcmp.gt.f32.partialorder %v726_v0, 0.0  ;;  %v790_v3 = vmul.f32 0.15, %v726_v0  ;;  %v805_v4 = vsel %vm773_vm5, %v723_v58, %v789_v63 }
 0x108   : > { %v808_v5 = vsel %vm776_vm6, %v734_v61, %v792_v1 }
 0x109   : > { %v806_v6 = vsel %vm774_vm7, %v726_v0, %v790_v3  ;;  %v820_v7 = vpack.c.bf16 %v808_v5, %v807_v2  ;;  %v2414_v8 = vpop.f32.mrb[8].mxu0 }
 0x10a   : > { %v819_v9 = vpack.c.bf16 %v806_v6, %v805_v4  ;;  %v747_v10 = vadd.f32 %v2414_v8, %v2941_v36  ;;  %v738_v11 = vpop.f32.mrb[9].mxu0 }
 0x10b   : > { %v739_v12 = vadd.f32 %v2941_v36, %v738_v11  ;;  %v2415_v13 = vpop.f32.mrb[10].mxu0 }
 0x10c   : > { %2440 = vmatprep.mubr.bf16.mxu1 %v819_v9  ;;  %vm779_vm8 = vcmp.gt.f32.partialorder %v747_v10, 0.0  ;;  %v795_v14 = vmul.f32 0.15, %v747_v10  ;;  %v750_v15 = vadd.f32 %v2415_v13, %v2941_v36  ;;  %v741_v16 = vpop.f32.mrb[11].mxu0 }
 0x10d   : > { %2441 = vmatmul.mubr.bf16.gmra.mrb[4].mxu1 %v820_v7  ;;  %vm777_vm9 = vcmp.gt.f32.partialorder %v739_v12, 0.0  ;;  %v793_v17 = vmul.f32 0.15, %v739_v12  ;;  %v742_v18 = vadd.f32 %v2941_v36, %v741_v16 }
 0x10e   : > { %vm780_vm10 = vcmp.gt.f32.partialorder %v750_v15, 0.0  ;;  %v796_v19 = vmul.f32 0.15, %v750_v15  ;;  %v811_v20 = vsel %vm779_vm8, %v747_v10, %v795_v14 }
 0x10f   : > { %vm778_vm11 = vcmp.gt.f32.partialorder %v742_v18, 0.0  ;;  %v794_v21 = vmul.f32 0.15, %v742_v18  ;;  %v809_v22 = vsel %vm777_vm9, %v739_v12, %v793_v17 }
 0x110   : > { %v812_v23 = vsel %vm780_vm10, %v750_v15, %v796_v19 }
 0x111   : > { %v810_v24 = vsel %vm778_vm11, %v742_v18, %v794_v21  ;;  %v822_v25 = vpack.c.bf16 %v812_v23, %v811_v20  ;;  %v2418_v26 = vpop.f32.mrb[12].mxu0 }
 0x112   : > { %v821_v27 = vpack.c.bf16 %v810_v24, %v809_v22  ;;  %v763_v28 = vadd.f32 %v2418_v26, %v2941_v36  ;;  %v754_v29 = vpop.f32.mrb[13].mxu0 }
 0x113   : > { %v755_v30 = vadd.f32 %v2941_v36, %v754_v29  ;;  %v2419_v31 = vpop.f32.mrb[14].mxu0 }
 0x114   : > { %2444 = vmatprep.mubr.bf16.mxu1 %v821_v27  ;;  %vm783_vm12 = vcmp.gt.f32.partialorder %v763_v28, 0.0  ;;  %v799_v32 = vmul.f32 0.15, %v763_v28  ;;  %v766_v33 = vadd.f32 %v2419_v31, %v2941_v36  ;;  %v757_v34 = vpop.f32.mrb[15].mxu0 }
 0x115   : > { %2445 = vmatmul.mubr.bf16.gmra.mrb[8].mxu1 %v822_v25  ;;  %vm781_vm13 = vcmp.gt.f32.partialorder %v755_v30, 0.0  ;;  %v797_v35 = vmul.f32 0.15, %v755_v30  ;;  %v758_v37 = vadd.f32 %v2941_v36, %v757_v34  ;;  %v2615_v36 = vld [vmem:[%s3316_s6 + $0x60] ss:$8 sps:$4 sm:$0xff]  }
 0x116   : > { %vm784_vm14 = vcmp.gt.f32.partialorder %v766_v33, 0.0  ;;  %v800_v38 = vmul.f32 0.15, %v766_v33  ;;  %v815_v39 = vsel %vm783_vm12, %v763_v28, %v799_v32  ;;  %1170 = vmatpush1.bf16.msra.mxu0 %v2615_v36 }
 0x117   : > { %vm782_vm15 = vcmp.gt.f32.partialorder %v758_v37, 0.0  ;;  %v798_v40 = vmul.f32 0.15, %v758_v37  ;;  %v813_v41 = vsel %vm781_vm13, %v755_v30, %v797_v35  ;;  %1171 = vmatprep.subr.bf16.mxu0 %v2620_v47 }
 0x118   : > { %v816_v42 = vsel %vm784_vm14, %v766_v33, %v800_v38 }
 0x119   : > { %v814_v43 = vsel %vm782_vm15, %v758_v37, %v798_v40  ;;  %v824_v44 = vpack.c.bf16 %v816_v42, %v815_v39 }
 0x11a   : > { %v823_v45 = vpack.c.bf16 %v814_v43, %v813_v41  ;;  %1172 = vmatpush1.bf16.msra.mxu0 %v2618_v48 }
 0x11c   : > { %2448 = vmatprep.mubr.bf16.mxu1 %v823_v45 }
 0x11d   : > { %2449 = vmatmul.mubr.bf16.gmra.mrb[12].mxu1 %v824_v44 }
 0x1d8   : > { %v2438_v51 = vpop.f32.mrb[0].mxu1 }
 0x1d9   : > { %v939_v52 = vadd.f32 %v2438_v51, %v2975_v50  ;;  %v930_v53 = vpop.f32.mrb[1].mxu1 }
 0x1da   : > { %v931_v54 = vadd.f32 %v2975_v50, %v930_v53  ;;  %v2439_v55 = vpop.f32.mrb[2].mxu1 }
 0x1db   : > { %v1011_v56 = vmul.f32 0.15, %v939_v52  ;;  %v942_v57 = vadd.f32 %v2439_v55, %v2975_v50  ;;  %v933_v58 = vpop.f32.mrb[3].mxu1  ;;  %vm995_vm0 = vcmp.gt.f32.partialorder %v939_v52, 0.0 }
 0x1dc   : > { %v1009_v59 = vmul.f32 0.15, %v931_v54  ;;  %v934_v60 = vadd.f32 %v2975_v50, %v933_v58  ;;  %vm993_vm1 = vcmp.gt.f32.partialorder %v931_v54, 0.0 }
 0x1dd   : > { %vm996_vm2 = vcmp.gt.f32.partialorder %v942_v57, 0.0  ;;  %v1012_v61 = vmul.f32 0.15, %v942_v57  ;;  %v1027_v63 = vsel %vm995_vm0, %v939_v52, %v1011_v56 }
 0x1de   : > { %vm994_vm3 = vcmp.gt.f32.partialorder %v934_v60, 0.0  ;;  %v1010_v62 = vmul.f32 0.15, %v934_v60  ;;  %v1025_v1 = vsel %vm993_vm1, %v931_v54, %v1009_v59 }
 0x1df   : > { %v1028_v0 = vsel %vm996_vm2, %v942_v57, %v1012_v61  ;;  %v2622_v61 = vld [vmem:[%s3318_s8 + $0x8] sm:$0xff]  }
 0x1e0   : > { %v1026_v2 = vsel %vm994_vm3, %v934_v60, %v1010_v62  ;;  %v2442_v3 = vpop.f32.mrb[4].mxu1  ;;  %v1042_v4 = vpack.c.bf16 %v1028_v0, %v1027_v63  ;;  %v2623_v62 = vld [vmem:[%s3318_s8 + $0x10] sm:$0xff]   ;;  %v2625_v63 = vld [vmem:[%s3318_s8 + $0x20] sm:$0xff]   ;;  %v2626_v0 = vld [vmem:[%s3318_s8 + $0x28] sm:$0xff]  }
 0x1e1   : > { %v1041_v5 = vpack.c.bf16 %v1026_v2, %v1025_v1  ;;  %v955_v6 = vadd.f32 %v2442_v3, %v2975_v50  ;;  %v946_v7 = vpop.f32.mrb[5].mxu1  ;;  %v2627_v1 = vld [vmem:[%s3318_s8 + $0x30] sm:$0xff]   ;;  %v2628_v2 = vld [vmem:[%s3318_s8 + $0x38] sm:$0xff]   ;;  %v3027_v3 = vld [vmem:[%s3320_s10] sm:$0xff]  }
 0x1e2   : > { %v947_v8 = vadd.f32 %v2975_v50, %v946_v7  ;;  %v2443_v9 = vpop.f32.mrb[6].mxu1  ;;  %v1065_v7 = vld [vmem:[%s3317_s7] sm:$0x3] }
 0x1e3   : > { %v1015_v10 = vmul.f32 0.15, %v955_v6  ;;  %v958_v11 = vadd.f32 %v2443_v9, %v2975_v50  ;;  %v949_v12 = vpop.f32.mrb[7].mxu1  ;;  %1190 = vmatmul.mubr.bf16.vlgmr.msra.gmra.mrb[16].mxu0 %v1041_v5  ;;  %vm999_vm4 = vcmp.gt.f32.partialorder %v955_v6, 0.0 }
 0x1e4   : > { %v1013_v13 = vmul.f32 0.15, %v947_v8  ;;  %v950_v14 = vadd.f32 %v2975_v50, %v949_v12  ;;  %1199 = vmatprep.mubr.bf16.mxu0 %v2749_v49  ;;  %vm997_vm5 = vcmp.gt.f32.partialorder %v947_v8, 0.0 }
 0x1e5   : > { %vm1000_vm6 = vcmp.gt.f32.partialorder %v958_v11, 0.0  ;;  %v1016_v15 = vmul.f32 0.15, %v958_v11  ;;  %v1031_v17 = vsel %vm999_vm4, %v955_v6, %v1015_v10 }
 0x1e6   : > { %vm998_vm7 = vcmp.gt.f32.partialorder %v950_v14, 0.0  ;;  %v1014_v16 = vmul.f32 0.15, %v950_v14  ;;  %v1029_v20 = vsel %vm997_vm5, %v947_v8, %v1013_v13 }
 0x1e7   : > { %v1032_v18 = vsel %vm1000_vm6, %v958_v11, %v1016_v15 }
 0x1e8   : > { %v2446_v19 = vpop.f32.mrb[8].mxu1  ;;  %v1030_v21 = vsel %vm998_vm7, %v950_v14, %v1014_v16  ;;  %v1044_v22 = vpack.c.bf16 %v1032_v18, %v1031_v17 }
 0x1e9   : > { %v971_v23 = vadd.f32 %v2446_v19, %v2975_v50  ;;  %v962_v24 = vpop.f32.mrb[9].mxu1  ;;  %v1043_v25 = vpack.c.bf16 %v1030_v21, %v1029_v20 }
 0x1ea   : > { %v963_v26 = vadd.f32 %v2975_v50, %v962_v24  ;;  %v2447_v27 = vpop.f32.mrb[10].mxu1 }
 0x1eb   : > { %1200 = vmatmul.mubr.bf16.gmra.mrb[20].mxu0 %v1042_v4  ;;  %vm1003_vm8 = vcmp.gt.f32.partialorder %v971_v23, 0.0  ;;  %v1019_v28 = vmul.f32 0.15, %v971_v23  ;;  %v974_v29 = vadd.f32 %v2447_v27, %v2975_v50  ;;  %v965_v30 = vpop.f32.mrb[11].mxu1  ;;  %v1067_v4 = vlaneseq }
 0x1ec   : > { %vm1001_vm9 = vcmp.gt.f32.partialorder %v963_v26, 0.0  ;;  %v1017_v31 = vmul.f32 0.15, %v963_v26  ;;  %v966_v32 = vadd.f32 %v2975_v50, %v965_v30  ;;  %1209 = vmatprep.mubr.bf16.mxu0 %v2749_v49 }
 0x1ed   : > { %vm1004_vm10 = vcmp.gt.f32.partialorder %v974_v29, 0.0  ;;  %v1020_v33 = vmul.f32 0.15, %v974_v29  ;;  %v1035_v34 = vsel %vm1003_vm8, %v971_v23, %v1019_v28  ;;  %v1068_v5 = vshrl.u32 %v1067_v4, 7 }
 0x1ee   : > { %vm1002_vm11 = vcmp.gt.f32.partialorder %v966_v32, 0.0  ;;  %v1018_v35 = vmul.f32 0.15, %v966_v32  ;;  %v1033_v37 = vsel %vm1001_vm9, %v963_v26, %v1017_v31 }
 0x1ef   : > { %v1036_v38 = vsel %vm1004_vm10, %v974_v29, %v1020_v33  ;;  %v1069_v6 = vsub.s32 0, %v1068_v5  ;;  %v1073_v8 = vsub.s32 1, %v1068_v5 }
 0x1f0   : > { %v2450_v39 = vpop.f32.mrb[12].mxu1  ;;  %v1034_v40 = vsel %vm1002_vm11, %v966_v32, %v1018_v35  ;;  %v1046_v41 = vpack.c.bf16 %v1036_v38, %v1035_v34 }
 0x1f1   : > { %v987_v42 = vadd.f32 %v2450_v39, %v2975_v50  ;;  %v978_v43 = vpop.f32.mrb[13].mxu1  ;;  %v1045_v44 = vpack.c.bf16 %v1034_v40, %v1033_v37  ;;  %v3034_v9 = vrot.slane %v1065_v7, %v1069_v6  ;;  %v3036_v10 = vrot.slane %v1065_v7, %v1073_v8  ;;  %v1318_v37 = vld [vmem:[%s3068_s16] sm:$0xff] }
 0x1f2   : > { %v979_v45 = vadd.f32 %v2975_v50, %v978_v43  ;;  %v2451_v46 = vpop.f32.mrb[14].mxu1  ;;  %v1319_v43 = vld [vmem:[%s3068_s16 + $0x8] sm:$0xff] }
 0x1f3   : > { %1210 = vmatmul.mubr.bf16.gmra.mrb[24].mxu0 %v1043_v25  ;;  %vm1007_vm12 = vcmp.gt.f32.partialorder %v987_v42, 0.0  ;;  %v1023_v36 = vmul.f32 0.15, %v987_v42  ;;  %v990_v47 = vadd.f32 %v2451_v46, %v2975_v50  ;;  %v981_v48 = vpop.f32.mrb[15].mxu1 }
 0x1f4   : > { %1219 = vmatprep.mubr.bf16.mxu0 %v2749_v49  ;;  %vm1005_vm13 = vcmp.gt.f32.partialorder %v979_v45, 0.0  ;;  %v1021_v51 = vmul.f32 0.15, %v979_v45  ;;  %v982_v52 = vadd.f32 %v2975_v50, %v981_v48  ;;  %v2621_v50 = vld [vmem:[%s3318_s8] sm:$0xff]  }
 0x1f5   : > { %vm1008_vm14 = vcmp.gt.f32.partialorder %v990_v47, 0.0  ;;  %v1024_v53 = vmul.f32 0.15, %v990_v47  ;;  %v1039_v54 = vsel %vm1007_vm12, %v987_v42, %v1023_v36  ;;  %2452 = vmatprep.subr.bf16.mxu1 %v2621_v50 }
 0x1f6   : > { %vm1006_vm15 = vcmp.gt.f32.partialorder %v982_v52, 0.0  ;;  %v1022_v55 = vmul.f32 0.15, %v982_v52  ;;  %v1037_v56 = vsel %vm1005_vm13, %v979_v45, %v1021_v51  ;;  %2453 = vmatpush3.bf16.msra.mxu1 %v2621_v50 }
 0x1f7   : > { %v1040_v57 = vsel %vm1008_vm14, %v990_v47, %v1024_v53  ;;  %2454 = vmatprep.subr.bf16.mxu1 %v2622_v61 }
 0x1f8   : > { %v1038_v58 = vsel %vm1006_vm15, %v982_v52, %v1022_v55  ;;  %v1048_v59 = vpack.c.bf16 %v1040_v57, %v1039_v54 }
 0x1f9   : > { %v1047_v60 = vpack.c.bf16 %v1038_v58, %v1037_v56  ;;  %v1320_v56 = vld [vmem:[%s3068_s16 + $0x10] sm:$0xff] }
 0x1fa   : > { %2455 = vmatpush3.bf16.msra.mxu1 %v2622_v61 }
 0x1fb   : > { %1220 = vmatmul.mubr.bf16.gmra.mrb[28].mxu0 %v1044_v22  ;;  %2456 = vmatprep.subr.bf16.mxu1 %v2623_v62 }
 0x1fc   : > { %1229 = vmatprep.mubr.bf16.mxu0 %v2749_v49 }
 0x1fe   : > { %2457 = vmatpush3.bf16.msra.mxu1 %v2623_v62  ;;  %v1321_v62 = vld [vmem:[%s3068_s16 + $0x18] sm:$0xff] }
 0x203   : > { %1230 = vmatmul.mubr.bf16.gmra.mrb[32].mxu0 %v1045_v44 }
 0x204   : > { %1239 = vmatprep.mubr.bf16.mxu0 %v2749_v49 }
 0x20b   : > { %1240 = vmatmul.mubr.bf16.gmra.mrb[36].mxu0 %v1046_v41 }
 0x20c   : > { %1249 = vmatprep.mubr.bf16.mxu0 %v2749_v49 }
 0x213   : > { %1250 = vmatmul.mubr.bf16.gmra.mrb[40].mxu0 %v1047_v60 }
 0x214   : > { %1259 = vmatprep.mubr.bf16.mxu0 %v2749_v49  ;;  %v2624_v49 = vld [vmem:[%s3318_s8 + $0x18] sm:$0xff]  }
 0x215   : > { %2458 = vmatprep.subr.bf16.mxu1 %v2624_v49 }
 0x216   : > { %2459 = vmatpush3.bf16.msra.mxu1 %v2624_v49 }
 0x217   : > { %2460 = vmatprep.subr.bf16.mxu1 %v2625_v63 }
 0x21a   : > { %2461 = vmatpush3.bf16.msra.mxu1 %v2625_v63 }
 0x21b   : > { %1260 = vmatmul.mubr.bf16.gmra.mrb[44].mxu0 %v1048_v59  ;;  %2462 = vmatprep.subr.bf16.mxu1 %v2626_v0 }
 0x21e   : > { %2463 = vmatpush3.bf16.msra.mxu1 %v2626_v0 }
 0x21f   : > { %2464 = vmatprep.subr.bf16.mxu1 %v2627_v1 }
 0x222   : > { %2465 = vmatpush3.bf16.msra.mxu1 %v2627_v1 }
 0x223   : > { %2466 = vmatprep.subr.bf16.mxu1 %v2628_v2 }
 0x226   : > { %2467 = vmatpush3.bf16.msra.mxu1 %v2628_v2 }
 0x227   : > { %2484 = vmatprep.subr.bf16.mxu1 %v3027_v3 }
 0x2b6   : > { %v1191_v11 = vpop.f32.mrb[16].mxu0 }
 0x2b7   : > { %v1192_v12 = vadd.f32 %v1191_v11, %v3034_v9  ;;  %v1193_v13 = vpop.f32.mrb[17].mxu0 }
 0x2b8   : > { %v1194_v14 = vadd.f32 %v1193_v13, %v3036_v10  ;;  %v1195_v15 = vpop.f32.mrb[18].mxu0 }
 0x2b9   : > { %2070 = vst [vmem:[%s3041_s26] sm:$0xff] %v1192_v12  ;;  %v1196_v16 = vadd.f32 %v1195_v15, %v3034_v9  ;;  %v1197_v17 = vpop.f32.mrb[19].mxu0 }
 0x2ba   : > { %v1270_v18 = vmul.f32 0.5, %v1194_v14  ;;  %2071 = vst [vmem:[%s3041_s26 + $0x8] sm:$0xff] %v1194_v14  ;;  %v1198_v19 = vadd.f32 %v1197_v17, %v3036_v10 }
 0x2bb   : > { %2072 = vst [vmem:[%s3041_s26 + $0x10] sm:$0xff] %v1196_v16 }
 0x2bc   : > { %v1286_v20 = vmul.f32 1.442695, %v1270_v18  ;;  %v1271_v21 = vmul.f32 0.5, %v1198_v19  ;;  %2073 = vst [vmem:[%s3041_s26 + $0x18] sm:$0xff] %v1198_v19 }
 0x2be   : > { %2645 = vpow2.f32 %v1286_v20  ;;  %v1288_v22 = vmul.f32 1.442695, %v1271_v21  ;;  %v1201_v23 = vpop.f32.mrb[20].mxu0  ;;  %v2630_v20 = vld [vmem:[%s3320_s10 + $0x8] sm:$0xff]  }
 0x2bf   : > { %v3052_v24 = vadd.f32 %v1201_v23, %v3034_v9  ;;  %v1203_v25 = vpop.f32.mrb[21].mxu0 }
 0x2c0   : > { %2647 = vpow2.f32 %v1288_v22  ;;  %v1204_v26 = vadd.f32 %v1203_v25, %v3036_v10  ;;  %v1205_v27 = vpop.f32.mrb[22].mxu0 }
 0x2c1   : > { %2074 = vst [vmem:[%s3041_s26 + $0x20] sm:$0xff] %v3052_v24  ;;  %v3059_v28 = vadd.f32 %v1205_v27, %v3034_v9  ;;  %v1207_v29 = vpop.f32.mrb[23].mxu0 }
 0x2c2   : > { %v1272_v30 = vmul.f32 0.5, %v1204_v26  ;;  %2075 = vst [vmem:[%s3041_s26 + $0x28] sm:$0xff] %v1204_v26  ;;  %v1208_v31 = vadd.f32 %v1207_v29, %v3036_v10 }
 0x2c3   : > { %2076 = vst [vmem:[%s3041_s26 + $0x30] sm:$0xff] %v3059_v28 }
 0x2c4   : > { %v1290_v32 = vmul.f32 1.442695, %v1272_v30  ;;  %v1273_v33 = vmul.f32 0.5, %v1208_v31  ;;  %2077 = vst [vmem:[%s3041_s26 + $0x38] sm:$0xff] %v1208_v31 }
 0x2c6   : > { %2649 = vpow2.f32 %v1290_v32  ;;  %v1292_v34 = vmul.f32 1.442695, %v1273_v33  ;;  %v1211_v35 = vpop.f32.mrb[24].mxu0  ;;  %v2631_v33 = vld [vmem:[%s3320_s10 + $0x10] sm:$0xff]  }
 0x2c7   : > { %v3075_v38 = vadd.f32 %v1211_v35, %v3034_v9  ;;  %v1213_v39 = vpop.f32.mrb[25].mxu0 }
 0x2c8   : > { %v2646_v40 = vpop.eup %2645  ;;  %2651 = vpow2.f32 %v1292_v34  ;;  %v1214_v41 = vadd.f32 %v1213_v39, %v3036_v10  ;;  %v1215_v42 = vpop.f32.mrb[26].mxu0 }
 0x2c9   : > { %2078 = vst [vmem:[%s3041_s26 + $0x40] sm:$0xff] %v3075_v38  ;;  %v3082_v44 = vadd.f32 %v1215_v42, %v3034_v9  ;;  %v1217_v45 = vpop.f32.mrb[27].mxu0  ;;  %v1334_v46 = vmul.f32 %v2646_v40, %v1318_v37  ;;  %v1324_v40 = vld [vmem:[%s3068_s16 + $0x30] sm:$0xff] }
 0x2ca   : > { %v2648_v36 = vpop.eup %2647  ;;  %v1274_v47 = vmul.f32 0.5, %v1214_v41  ;;  %2079 = vst [vmem:[%s3041_s26 + $0x48] sm:$0xff] %v1214_v41  ;;  %v1218_v48 = vadd.f32 %v1217_v45, %v3036_v10 }
 0x2cb   : > { %2080 = vst [vmem:[%s3041_s26 + $0x50] sm:$0xff] %v3082_v44  ;;  %v1335_v51 = vmul.f32 %v2648_v36, %v1319_v43  ;;  %v1350_v52 = vadd.f32 %v1334_v46, %v1192_v12  ;;  %v2632_v43 = vld [vmem:[%s3320_s10 + $0x18] sm:$0xff]  }
 0x2cc   : > { %v1294_v53 = vmul.f32 1.442695, %v1274_v47  ;;  %v1275_v54 = vmul.f32 0.5, %v1218_v48  ;;  %2081 = vst [vmem:[%s3041_s26 + $0x58] sm:$0xff] %v1218_v48  ;;  %v1325_v36 = vld [vmem:[%s3068_s16 + $0x38] sm:$0xff] }
 0x2cd   : > { %v1351_v55 = vadd.f32 %v1335_v51, %v1196_v16  ;;  %v1322_v16 = vld [vmem:[%s3068_s16 + $0x20] sm:$0xff] }
 0x2ce   : > { %2653 = vpow2.f32 %v1294_v53  ;;  %v1296_v57 = vmul.f32 1.442695, %v1275_v54  ;;  %v1221_v58 = vpop.f32.mrb[28].mxu0 }
 0x2cf   : > { %v3091_v59 = vadd.f32 %v1221_v58, %v3034_v9  ;;  %v1223_v60 = vpop.f32.mrb[29].mxu0  ;;  %v1366_v50 = vpack.c.bf16 %v1351_v55, %v1350_v52 }
 0x2d0   : > { %v2650_v61 = vpop.eup %2649  ;;  %2655 = vpow2.f32 %v1296_v57  ;;  %v1224_v49 = vadd.f32 %v1223_v60, %v3036_v10  ;;  %v1225_v63 = vpop.f32.mrb[30].mxu0  ;;  %v2633_v57 = vld [vmem:[%s3320_s10 + $0x20] sm:$0xff]  }
 0x2d1   : > { %v1336_v0 = vmul.f32 %v2650_v61, %v1320_v56  ;;  %2082 = vst [vmem:[%s3041_s26 + $0x60] sm:$0xff] %v3091_v59  ;;  %v3098_v1 = vadd.f32 %v1225_v63, %v3034_v9  ;;  %v1227_v2 = vpop.f32.mrb[31].mxu0  ;;  %2468 = vmatprep.mubr.bf16.mxu1 %v1366_v50 }
 0x2d2   : > { %v2652_v4 = vpop.eup %2651  ;;  %v1276_v5 = vmul.f32 0.5, %v1224_v49  ;;  %2083 = vst [vmem:[%s3041_s26 + $0x68] sm:$0xff] %v1224_v49  ;;  %v1228_v6 = vadd.f32 %v1227_v2, %v3036_v10  ;;  %v1326_v49 = vld [vmem:[%s3068_s16 + $0x40] sm:$0xff] }
 0x2d3   : > { %v1337_v7 = vmul.f32 %v2652_v4, %v1321_v62  ;;  %2084 = vst [vmem:[%s3041_s26 + $0x70] sm:$0xff] %v3098_v1  ;;  %v1352_v8 = vadd.f32 %v1336_v0, %v3052_v24  ;;  %v1323_v24 = vld [vmem:[%s3068_s16 + $0x28] sm:$0xff] }
 0x2d4   : > { %v1298_v11 = vmul.f32 1.442695, %v1276_v5  ;;  %v1277_v12 = vmul.f32 0.5, %v1228_v6  ;;  %2085 = vst [vmem:[%s3041_s26 + $0x78] sm:$0xff] %v1228_v6  ;;  %v1327_v6 = vld [vmem:[%s3068_s16 + $0x48] sm:$0xff] }
 0x2d5   : > { %v1353_v13 = vadd.f32 %v1337_v7, %v3059_v28 }
 0x2d6   : > { %2657 = vpow2.f32 %v1298_v11  ;;  %v1300_v14 = vmul.f32 1.442695, %v1277_v12  ;;  %v1231_v15 = vpop.f32.mrb[32].mxu0 }
 0x2d7   : > { %v3109_v17 = vadd.f32 %v1231_v15, %v3034_v9  ;;  %v1233_v18 = vpop.f32.mrb[33].mxu0  ;;  %v1367_v19 = vpack.c.bf16 %v1353_v13, %v1352_v8 }
 0x2d8   : > { %v2654_v21 = vpop.eup %2653  ;;  %2659 = vpow2.f32 %v1300_v14  ;;  %v1234_v22 = vadd.f32 %v1233_v18, %v3036_v10  ;;  %v1235_v23 = vpop.f32.mrb[34].mxu0 }
 0x2d9   : > { %2086 = vst [vmem:[%s3041_s26 + $0x80] sm:$0xff] %v3109_v17  ;;  %v3119_v25 = vadd.f32 %v1235_v23, %v3034_v9  ;;  %v1237_v26 = vpop.f32.mrb[35].mxu0  ;;  %2469 = vmatmul.mubr.bf16.vlgmr.msra.gmra.mrb[16].mxu1 %v1367_v19  ;;  %v1338_v27 = vmul.f32 %v2654_v21, %v1322_v16 }
 0x2da   : > { %v2656_v28 = vpop.eup %2655  ;;  %v1278_v29 = vmul.f32 0.5, %v1234_v22  ;;  %2087 = vst [vmem:[%s3041_s26 + $0x88] sm:$0xff] %v1234_v22  ;;  %v1238_v30 = vadd.f32 %v1237_v26, %v3036_v10  ;;  %2485 = vmatpush3.bf16.msra.mxu1 %v3027_v3  ;;  %v1328_v22 = vld [vmem:[%s3068_s16 + $0x50] sm:$0xff] }
 0x2db   : > { %2088 = vst [vmem:[%s3041_s26 + $0x90] sm:$0xff] %v3119_v25  ;;  %v1339_v31 = vmul.f32 %v2656_v28, %v1323_v24  ;;  %v1354_v32 = vadd.f32 %v1338_v27, %v3075_v38  ;;  %2486 = vmatprep.subr.bf16.mxu1 %v2630_v20 }
 0x2dc   : > { %v1302_v34 = vmul.f32 1.442695, %v1278_v29  ;;  %v1279_v35 = vmul.f32 0.5, %v1238_v30  ;;  %2089 = vst [vmem:[%s3041_s26 + $0x98] sm:$0xff] %v1238_v30  ;;  %v1329_v29 = vld [vmem:[%s3068_s16 + $0x58] sm:$0xff] }
 0x2dd   : > { %v1355_v37 = vadd.f32 %v1339_v31, %v3082_v44 }
 0x2de   : > { %2661 = vpow2.f32 %v1302_v34  ;;  %v1304_v39 = vmul.f32 1.442695, %v1279_v35  ;;  %v1241_v3 = vpop.f32.mrb[36].mxu0  ;;  %2487 = vmatpush3.bf16.msra.mxu1 %v2630_v20 }
 0x2df   : > { %v3134_v41 = vadd.f32 %v1241_v3, %v3034_v9  ;;  %v1243_v38 = vpop.f32.mrb[37].mxu0  ;;  %v1368_v42 = vpack.c.bf16 %v1355_v37, %v1354_v32  ;;  %2488 = vmatprep.subr.bf16.mxu1 %v2631_v33 }
 0x2e0   : > { %v2658_v45 = vpop.eup %2657  ;;  %2663 = vpow2.f32 %v1304_v39  ;;  %v1244_v44 = vadd.f32 %v1243_v38, %v3036_v10  ;;  %v1245_v46 = vpop.f32.mrb[38].mxu0  ;;  %v1330_v38 = vld [vmem:[%s3068_s16 + $0x60] sm:$0xff] }
 0x2e1   : > { %2090 = vst [vmem:[%s3041_s26 + $0xa0] sm:$0xff] %v3134_v41  ;;  %v3144_v47 = vadd.f32 %v1245_v46, %v3034_v9  ;;  %v1247_v48 = vpop.f32.mrb[39].mxu0  ;;  %2472 = vmatprep.mubr.bf16.mxu1 %v1368_v42  ;;  %v1340_v51 = vmul.f32 %v2658_v45, %v1324_v40  ;;  %v1331_v45 = vld [vmem:[%s3068_s16 + $0x68] sm:$0xff] }
 0x2e2   : > { %v2660_v52 = vpop.eup %2659  ;;  %v1280_v53 = vmul.f32 0.5, %v1244_v44  ;;  %2091 = vst [vmem:[%s3041_s26 + $0xa8] sm:$0xff] %v1244_v44  ;;  %v1248_v54 = vadd.f32 %v1247_v48, %v3036_v10  ;;  %2489 = vmatpush3.bf16.msra.mxu1 %v2631_v33  ;;  %v1332_v48 = vld [vmem:[%s3068_s16 + $0x70] sm:$0xff] }
 0x2e3   : > { %2092 = vst [vmem:[%s3041_s26 + $0xb0] sm:$0xff] %v3144_v47  ;;  %v1341_v55 = vmul.f32 %v2660_v52, %v1325_v36  ;;  %v1356_v56 = vadd.f32 %v1340_v51, %v3091_v59  ;;  %2490 = vmatprep.subr.bf16.mxu1 %v2632_v43 }
 0x2e4   : > { %v1306_v58 = vmul.f32 1.442695, %v1280_v53  ;;  %v1281_v60 = vmul.f32 0.5, %v1248_v54  ;;  %2093 = vst [vmem:[%s3041_s26 + $0xb8] sm:$0xff] %v1248_v54  ;;  %v1333_v53 = vld [vmem:[%s3068_s16 + $0x78] sm:$0xff] }
 0x2e5   : > { %v1357_v50 = vadd.f32 %v1341_v55, %v3098_v1 }
 0x2e6   : > { %2665 = vpow2.f32 %v1306_v58  ;;  %v1308_v61 = vmul.f32 1.442695, %v1281_v60  ;;  %v1251_v62 = vpop.f32.mrb[40].mxu0  ;;  %2491 = vmatpush3.bf16.msra.mxu1 %v2632_v43  ;;  %v2634_v60 = vld [vmem:[%s3320_s10 + $0x28] sm:$0xff]  }
 0x2e7   : > { %v3158_v63 = vadd.f32 %v1251_v62, %v3034_v9  ;;  %v1253_v59 = vpop.f32.mrb[41].mxu0  ;;  %v1369_v0 = vpack.c.bf16 %v1357_v50, %v1356_v56  ;;  %2492 = vmatprep.subr.bf16.mxu1 %v2633_v57  ;;  %v2635_v50 = vld [vmem:[%s3320_s10 + $0x30] sm:$0xff]   ;;  %v2637_v62 = vld [vmem:[%s3322_s12] sm:$0xff]  }
 0x2e8   : > { %v2662_v2 = vpop.eup %2661  ;;  %2667 = vpow2.f32 %v1308_v61  ;;  %v1254_v4 = vadd.f32 %v1253_v59, %v3036_v10  ;;  %v1255_v5 = vpop.f32.mrb[42].mxu0  ;;  %v2636_v61 = vld [vmem:[%s3320_s10 + $0x38] sm:$0xff]   ;;  %2516 = vmatprep.subr.bf16.mxu0 %v2637_v62 }
 0x2e9   : > { %2094 = vst [vmem:[%s3041_s26 + $0xc0] sm:$0xff] %v3158_v63  ;;  %v1256_v1 = vadd.f32 %v1255_v5, %v3034_v9  ;;  %v1257_v7 = vpop.f32.mrb[43].mxu0  ;;  %2473 = vmatmul.mubr.bf16.gmra.mrb[20].mxu1 %v1369_v0  ;;  %v1342_v8 = vmul.f32 %v2662_v2, %v1326_v49  ;;  %v2638_v49 = vld [vmem:[%s3322_s12 + $0x8] sm:$0xff]   ;;  %2517 = vmatpush3.bf16.msra.mxu0 %v2637_v62  ;;  %v2640_v59 = vld [vmem:[%s3322_s12 + $0x18] sm:$0xff]   ;;  %v2641_v0 = vld [vmem:[%s3322_s12 + $0x20] sm:$0xff]  }
 0x2ea   : > { %v2664_v11 = vpop.eup %2663  ;;  %v1282_v12 = vmul.f32 0.5, %v1254_v4  ;;  %2095 = vst [vmem:[%s3041_s26 + $0xc8] sm:$0xff] %v1254_v4  ;;  %v1258_v13 = vadd.f32 %v1257_v7, %v3036_v10  ;;  %2493 = vmatpush3.bf16.msra.mxu1 %v2633_v57  ;;  %2518 = vmatprep.subr.bf16.mxu0 %v2638_v49  ;;  %v3215_v2 = vld [vmem:[%s3319_s9] ss:$0 sm:$0xff] }
 0x2eb   : > { %2096 = vst [vmem:[%s3041_s26 + $0xd0] sm:$0xff] %v1256_v1  ;;  %v1343_v14 = vmul.f32 %v2664_v11, %v1327_v6  ;;  %v1358_v15 = vadd.f32 %v1342_v8, %v3109_v17  ;;  %2494 = vmatprep.subr.bf16.mxu1 %v2634_v60 }
 0x2ec   : > { %v1310_v16 = vmul.f32 1.442695, %v1282_v12  ;;  %v1283_v18 = vmul.f32 0.5, %v1258_v13  ;;  %2097 = vst [vmem:[%s3041_s26 + $0xd8] sm:$0xff] %v1258_v13 }
 0x2ed   : > { %v1359_v19 = vadd.f32 %v1343_v14, %v3119_v25  ;;  %2519 = vmatpush3.bf16.msra.mxu0 %v2638_v49 }
 0x2ee   : > { %2669 = vpow2.f32 %v1310_v16  ;;  %v1312_v20 = vmul.f32 1.442695, %v1283_v18  ;;  %v1261_v21 = vpop.f32.mrb[44].mxu0  ;;  %2495 = vmatpush3.bf16.msra.mxu1 %v2634_v60 }
 0x2ef   : > { %v1262_v23 = vadd.f32 %v1261_v21, %v3034_v9  ;;  %v1263_v24 = vpop.f32.mrb[45].mxu0  ;;  %v1370_v26 = vpack.c.bf16 %v1359_v19, %v1358_v15  ;;  %2496 = vmatprep.subr.bf16.mxu1 %v2635_v50 }
 0x2f0   : > { %v2666_v27 = vpop.eup %2665  ;;  %2671 = vpow2.f32 %v1312_v20  ;;  %v1264_v17 = vadd.f32 %v1263_v24, %v3036_v10  ;;  %v1265_v28 = vpop.f32.mrb[46].mxu0 }
 0x2f1   : > { %2098 = vst [vmem:[%s3041_s26 + $0xe0] sm:$0xff] %v1262_v23  ;;  %v1266_v25 = vadd.f32 %v1265_v28, %v3034_v9  ;;  %v1267_v30 = vpop.f32.mrb[47].mxu0  ;;  %2476 = vmatprep.mubr.bf16.mxu1 %v1370_v26  ;;  %v1344_v31 = vmul.f32 %v2666_v27, %v1328_v22 }
 0x2f2   : > { %v2668_v32 = vpop.eup %2667  ;;  %v1284_v33 = vmul.f32 0.5, %v1264_v17  ;;  %2099 = vst [vmem:[%s3041_s26 + $0xe8] sm:$0xff] %v1264_v17  ;;  %v1268_v34 = vadd.f32 %v1267_v30, %v3036_v10  ;;  %2497 = vmatpush3.bf16.msra.mxu1 %v2635_v50 }
 0x2f3   : > { %2100 = vst [vmem:[%s3041_s26 + $0xf0] sm:$0xff] %v1266_v25  ;;  %v1345_v35 = vmul.f32 %v2668_v32, %v1329_v29  ;;  %v1360_v37 = vadd.f32 %v1344_v31, %v3134_v41  ;;  %2498 = vmatprep.subr.bf16.mxu1 %v2636_v61 }
 0x2f4   : > { %v1314_v39 = vmul.f32 1.442695, %v1284_v33  ;;  %v1285_v3 = vmul.f32 0.5, %v1268_v34  ;;  %2101 = vst [vmem:[%s3041_s26 + $0xf8] sm:$0xff] %v1268_v34 }
 0x2f5   : > { %v1361_v9 = vadd.f32 %v1345_v35, %v3144_v47 }
 0x2f6   : > { %2673 = vpow2.f32 %v1314_v39  ;;  %v1316_v40 = vmul.f32 1.442695, %v1285_v3  ;;  %2499 = vmatpush3.bf16.msra.mxu1 %v2636_v61 }
 0x2f7   : > { %v1371_v42 = vpack.c.bf16 %v1361_v9, %v1360_v37  ;;  %2548 = vmatprep.subr.bf16.mxu1 %v2637_v62 }
 0x2f8   : > { %v2670_v43 = vpop.eup %2669  ;;  %2675 = vpow2.f32 %v1316_v40 }
 0x2f9   : > { %2477 = vmatmul.mubr.bf16.gmra.mrb[24].mxu1 %v1371_v42  ;;  %v1346_v10 = vmul.f32 %v2670_v43, %v1330_v38 }
 0x2fa   : > { %v2672_v44 = vpop.eup %2671 }
 0x2fb   : > { %v1347_v46 = vmul.f32 %v2672_v44, %v1331_v45  ;;  %v1362_v41 = vadd.f32 %v1346_v10, %v3158_v63  ;;  %v2639_v63 = vld [vmem:[%s3322_s12 + $0x10] sm:$0xff]  }
 0x2fc   : > { %2520 = vmatprep.subr.bf16.mxu0 %v2639_v63 }
 0x2fd   : > { %v1363_v36 = vadd.f32 %v1347_v46, %v1256_v1  ;;  %2521 = vmatpush3.bf16.msra.mxu0 %v2639_v63 }
 0x2fe   : > { %2522 = vmatprep.subr.bf16.mxu0 %v2640_v59 }
 0x2ff   : > { %v1372_v51 = vpack.c.bf16 %v1363_v36, %v1362_v41 }
 0x300   : > { %v2674_v52 = vpop.eup %2673 }
 0x301   : > { %2480 = vmatprep.mubr.bf16.mxu1 %v1372_v51  ;;  %v1348_v47 = vmul.f32 %v2674_v52, %v1332_v48  ;;  %2523 = vmatpush3.bf16.msra.mxu0 %v2640_v59 }
 0x302   : > { %v2676_v54 = vpop.eup %2675  ;;  %2524 = vmatprep.subr.bf16.mxu0 %v2641_v0 }
 0x303   : > { %v1349_v55 = vmul.f32 %v2676_v54, %v1333_v53  ;;  %v1364_v56 = vadd.f32 %v1348_v47, %v1262_v23 }
 0x305   : > { %v1365_v57 = vadd.f32 %v1349_v55, %v1266_v25  ;;  %2525 = vmatpush3.bf16.msra.mxu0 %v2641_v0 }
 0x307   : > { %v1373_v58 = vpack.c.bf16 %v1365_v57, %v1364_v56 }
 0x309   : > { %2481 = vmatmul.mubr.bf16.gmra.mrb[28].mxu1 %v1373_v58 }
 0x3ac   : > { %v2470_v4 = vpop.f32.mrb[16].mxu1 }
 0x3ad   : > { %v1488_v5 = vadd.f32 %v2470_v4, %v3215_v2  ;;  %v1479_v6 = vpop.f32.mrb[17].mxu1 }
 0x3ae   : > { %v1480_v1 = vadd.f32 %v3215_v2, %v1479_v6  ;;  %v2471_v7 = vpop.f32.mrb[18].mxu1 }
 0x3af   : > { %v1560_v8 = vmul.f32 0.15, %v1488_v5  ;;  %v1491_v11 = vadd.f32 %v2471_v7, %v3215_v2  ;;  %v1482_v12 = vpop.f32.mrb[19].mxu1  ;;  %vm1544_vm0 = vcmp.gt.f32.partialorder %v1488_v5, 0.0 }
 0x3b0   : > { %v1558_v13 = vmul.f32 0.15, %v1480_v1  ;;  %v1483_v14 = vadd.f32 %v3215_v2, %v1482_v12  ;;  %vm1542_vm1 = vcmp.gt.f32.partialorder %v1480_v1, 0.0 }
 0x3b1   : > { %vm1545_vm2 = vcmp.gt.f32.partialorder %v1491_v11, 0.0  ;;  %v1561_v15 = vmul.f32 0.15, %v1491_v11  ;;  %v1576_v18 = vsel %vm1544_vm0, %v1488_v5, %v1560_v8 }
 0x3b2   : > { %vm1543_vm3 = vcmp.gt.f32.partialorder %v1483_v14, 0.0  ;;  %v1559_v16 = vmul.f32 0.15, %v1483_v14  ;;  %v1574_v21 = vsel %vm1542_vm1, %v1480_v1, %v1558_v13 }
 0x3b3   : > { %v1577_v19 = vsel %vm1545_vm2, %v1491_v11, %v1561_v15  ;;  %v2644_v15 = vld [vmem:[%s3322_s12 + $0x38] sm:$0xff]  }
 0x3b4   : > { %v1591_v20 = vpack.c.bf16 %v1577_v19, %v1576_v18  ;;  %v1575_v22 = vsel %vm1543_vm3, %v1483_v14, %v1559_v16  ;;  %v2642_v14 = vld [vmem:[%s3322_s12 + $0x28] sm:$0xff]   ;;  %v3245_v16 = vld [vmem:[%s3321_s11] ss:$0 sm:$0xff] }
 0x3b5   : > { %v1590_v23 = vpack.c.bf16 %v1575_v22, %v1574_v21  ;;  %2526 = vmatprep.subr.bf16.mxu0 %v2642_v14 }
 0x3b6   : > { %2527 = vmatpush3.bf16.msra.mxu0 %v2642_v14 }
 0x3b7   : > { %2500 = vmatprep.mubr.bf16.mxu1 %v1590_v23 }
 0x3b8   : > { %2501 = vmatmul.mubr.bf16.vlgmr.msra.gmra.mrb[32].mxu1 %v1591_v20 }
 0x3b9   : > { %2556 = vmatpush3.bf16.msra.mxu1 %v2637_v62 }
 0x3ba   : > { %2549 = vmatprep.subr.bf16.mxu1 %v2638_v49 }
 0x3bc   : > { %v2474_v24 = vpop.f32.mrb[20].mxu1 }
 0x3bd   : > { %v1504_v26 = vadd.f32 %v2474_v24, %v3215_v2  ;;  %v1495_v27 = vpop.f32.mrb[21].mxu1  ;;  %2557 = vmatpush3.bf16.msra.mxu1 %v2638_v49 }
 0x3be   : > { %v1496_v17 = vadd.f32 %v3215_v2, %v1495_v27  ;;  %v2475_v28 = vpop.f32.mrb[22].mxu1  ;;  %2550 = vmatprep.subr.bf16.mxu1 %v2639_v63 }
 0x3bf   : > { %v1564_v29 = vmul.f32 0.15, %v1504_v26  ;;  %v1507_v25 = vadd.f32 %v2475_v28, %v3215_v2  ;;  %v1498_v30 = vpop.f32.mrb[23].mxu1  ;;  %vm1548_vm4 = vcmp.gt.f32.partialorder %v1504_v26, 0.0 }
 0x3c0   : > { %v1562_v31 = vmul.f32 0.15, %v1496_v17  ;;  %v1499_v32 = vadd.f32 %v3215_v2, %v1498_v30  ;;  %vm1546_vm5 = vcmp.gt.f32.partialorder %v1496_v17, 0.0 }
 0x3c1   : > { %vm1549_vm6 = vcmp.gt.f32.partialorder %v1507_v25, 0.0  ;;  %v1565_v33 = vmul.f32 0.15, %v1507_v25  ;;  %2558 = vmatpush3.bf16.msra.mxu1 %v2639_v63  ;;  %v1580_v35 = vsel %vm1548_vm4, %v1504_v26, %v1564_v29 }
 0x3c2   : > { %vm1547_vm7 = vcmp.gt.f32.partialorder %v1499_v32, 0.0  ;;  %v1563_v34 = vmul.f32 0.15, %v1499_v32  ;;  %2551 = vmatprep.subr.bf16.mxu1 %v2640_v59  ;;  %v1578_v39 = vsel %vm1546_vm5, %v1496_v17, %v1562_v31 }
 0x3c3   : > { %v1581_v37 = vsel %vm1549_vm6, %v1507_v25, %v1565_v33 }
 0x3c4   : > { %v1579_v3 = vsel %vm1547_vm7, %v1499_v32, %v1563_v34  ;;  %v1593_v9 = vpack.c.bf16 %v1581_v37, %v1580_v35 }
 0x3c5   : > { %v1592_v40 = vpack.c.bf16 %v1579_v3, %v1578_v39  ;;  %2559 = vmatpush3.bf16.msra.mxu1 %v2640_v59 }
 0x3c6   : > { %2552 = vmatprep.subr.bf16.mxu1 %v2641_v0 }
 0x3c7   : > { %2504 = vmatprep.mubr.bf16.mxu1 %v1592_v40 }
 0x3c8   : > { %2505 = vmatmul.mubr.bf16.gmra.mrb[36].mxu1 %v1593_v9 }
 0x3c9   : > { %2560 = vmatpush3.bf16.msra.mxu1 %v2641_v0 }
 0x3ca   : > { %2553 = vmatprep.subr.bf16.mxu1 %v2642_v14 }
 0x3cc   : > { %v2478_v38 = vpop.f32.mrb[24].mxu1 }
 0x3cd   : > { %v1520_v42 = vadd.f32 %v2478_v38, %v3215_v2  ;;  %v1511_v43 = vpop.f32.mrb[25].mxu1  ;;  %2561 = vmatpush3.bf16.msra.mxu1 %v2642_v14 }
 0x3ce   : > { %v1512_v45 = vadd.f32 %v3215_v2, %v1511_v43  ;;  %v2479_v10 = vpop.f32.mrb[26].mxu1 }
 0x3cf   : > { %v1568_v44 = vmul.f32 0.15, %v1520_v42  ;;  %v1523_v46 = vadd.f32 %v2479_v10, %v3215_v2  ;;  %v1514_v41 = vpop.f32.mrb[27].mxu1  ;;  %vm1552_vm8 = vcmp.gt.f32.partialorder %v1520_v42, 0.0 }
 0x3d0   : > { %v1566_v36 = vmul.f32 0.15, %v1512_v45  ;;  %v1515_v48 = vadd.f32 %v3215_v2, %v1514_v41  ;;  %vm1550_vm9 = vcmp.gt.f32.partialorder %v1512_v45, 0.0 }
 0x3d1   : > { %vm1553_vm10 = vcmp.gt.f32.partialorder %v1523_v46, 0.0  ;;  %v1569_v51 = vmul.f32 0.15, %v1523_v46  ;;  %v1584_v53 = vsel %vm1552_vm8, %v1520_v42, %v1568_v44 }
 0x3d2   : > { %vm1551_vm11 = vcmp.gt.f32.partialorder %v1515_v48, 0.0  ;;  %v1567_v52 = vmul.f32 0.15, %v1515_v48  ;;  %v1582_v54 = vsel %vm1550_vm9, %v1512_v45, %v1566_v36 }
 0x3d3   : > { %v1585_v47 = vsel %vm1553_vm10, %v1523_v46, %v1569_v51 }
 0x3d4   : > { %v1583_v55 = vsel %vm1551_vm11, %v1515_v48, %v1567_v52  ;;  %v1595_v56 = vpack.c.bf16 %v1585_v47, %v1584_v53 }
 0x3d5   : > { %v1594_v57 = vpack.c.bf16 %v1583_v55, %v1582_v54 }
 0x3d7   : > { %2508 = vmatprep.mubr.bf16.mxu1 %v1594_v57 }
 0x3d8   : > { %2509 = vmatmul.mubr.bf16.gmra.mrb[40].mxu1 %v1595_v56 }
 0x3dc   : > { %v2482_v58 = vpop.f32.mrb[28].mxu1 }
 0x3dd   : > { %v1536_v60 = vadd.f32 %v2482_v58, %v3215_v2  ;;  %v1527_v50 = vpop.f32.mrb[29].mxu1 }
 0x3de   : > { %v1528_v61 = vadd.f32 %v3215_v2, %v1527_v50  ;;  %v2483_v62 = vpop.f32.mrb[30].mxu1 }
 0x3df   : > { %v1572_v49 = vmul.f32 0.15, %v1536_v60  ;;  %v1539_v63 = vadd.f32 %v2483_v62, %v3215_v2  ;;  %v1530_v59 = vpop.f32.mrb[31].mxu1  ;;  %vm1556_vm12 = vcmp.gt.f32.partialorder %v1536_v60, 0.0 }
 0x3e0   : > { %v1570_v0 = vmul.f32 0.15, %v1528_v61  ;;  %v1531_v4 = vadd.f32 %v3215_v2, %v1530_v59  ;;  %vm1554_vm13 = vcmp.gt.f32.partialorder %v1528_v61, 0.0  ;;  %v2643_v2 = vld [vmem:[%s3322_s12 + $0x30] sm:$0xff]  }
 0x3e1   : > { %vm1557_vm14 = vcmp.gt.f32.partialorder %v1539_v63, 0.0  ;;  %v1573_v5 = vmul.f32 0.15, %v1539_v63  ;;  %v1588_v1 = vsel %vm1556_vm12, %v1536_v60, %v1572_v49  ;;  %2528 = vmatprep.subr.bf16.mxu0 %v2643_v2  ;;  %2554 = vmatprep.subr.bf16.mxu1 %v2643_v2 }
 0x3e2   : > { %vm1555_vm15 = vcmp.gt.f32.partialorder %v1531_v4, 0.0  ;;  %v1571_v6 = vmul.f32 0.15, %v1531_v4  ;;  %v1586_v8 = vsel %vm1554_vm13, %v1528_v61, %v1570_v0  ;;  %2529 = vmatpush3.bf16.msra.mxu0 %v2643_v2  ;;  %2562 = vmatpush3.bf16.msra.mxu1 %v2643_v2 }
 0x3e3   : > { %v1589_v7 = vsel %vm1557_vm14, %v1539_v63, %v1573_v5  ;;  %2530 = vmatprep.subr.bf16.mxu0 %v2644_v15  ;;  %2555 = vmatprep.subr.bf16.mxu1 %v2644_v15 }
 0x3e4   : > { %v1587_v11 = vsel %vm1555_vm15, %v1531_v4, %v1571_v6  ;;  %v1597_v12 = vpack.c.bf16 %v1589_v7, %v1588_v1 }
 0x3e5   : > { %v1596_v13 = vpack.c.bf16 %v1587_v11, %v1586_v8 }
 0x3e6   : > { %2531 = vmatpush3.bf16.msra.mxu0 %v2644_v15  ;;  %2563 = vmatpush3.bf16.msra.mxu1 %v2644_v15 }
 0x3e7   : > { %2512 = vmatprep.mubr.bf16.mxu1 %v1596_v13 }
 0x3e8   : > { %2513 = vmatmul.mubr.bf16.gmra.mrb[44].mxu1 %v1597_v12 }
 0x48b   : > { %v2502_v18 = vpop.f32.mrb[32].mxu1 }
 0x48c   : > { %v1712_v19 = vadd.f32 %v2502_v18, %v3245_v16  ;;  %v1703_v20 = vpop.f32.mrb[33].mxu1 }
 0x48d   : > { %v1704_v21 = vadd.f32 %v3245_v16, %v1703_v20  ;;  %v2503_v22 = vpop.f32.mrb[34].mxu1 }
 0x48e   : > { %v1784_v23 = vmul.f32 0.15, %v1712_v19  ;;  %v1715_v24 = vadd.f32 %v2503_v22, %v3245_v16  ;;  %v1706_v26 = vpop.f32.mrb[35].mxu1  ;;  %vm1768_vm0 = vcmp.gt.f32.partialorder %v1712_v19, 0.0 }
 0x48f   : > { %v1782_v27 = vmul.f32 0.15, %v1704_v21  ;;  %v1707_v17 = vadd.f32 %v3245_v16, %v1706_v26  ;;  %vm1766_vm1 = vcmp.gt.f32.partialorder %v1704_v21, 0.0 }
 0x490   : > { %vm1769_vm2 = vcmp.gt.f32.partialorder %v1715_v24, 0.0  ;;  %v1785_v28 = vmul.f32 0.15, %v1715_v24  ;;  %v1800_v25 = vsel %vm1768_vm0, %v1712_v19, %v1784_v23 }
 0x491   : > { %vm1767_vm3 = vcmp.gt.f32.partialorder %v1707_v17, 0.0  ;;  %v1783_v29 = vmul.f32 0.15, %v1707_v17  ;;  %v1798_v32 = vsel %vm1766_vm1, %v1704_v21, %v1782_v27 }
 0x492   : > { %v1801_v30 = vsel %vm1769_vm2, %v1715_v24, %v1785_v28 }
 0x493   : > { %v1815_v31 = vpack.c.bf16 %v1801_v30, %v1800_v25  ;;  %v1799_v33 = vsel %vm1767_vm3, %v1707_v17, %v1783_v29  ;;  %v3266_v17 = vld [vmem:[%s3323_s13] ss:$0 sm:$0xff] }
 0x494   : > { %v1814_v34 = vpack.c.bf16 %v1799_v33, %v1798_v32 }
 0x496   : > { %2532 = vmatprep.mubr.bf16.mxu0 %v1814_v34 }
 0x497   : > { %2533 = vmatmul.mubr.bf16.vlgmr.msra.gmra.mrb[48].mxu0 %v1815_v31 }
 0x49b   : > { %v2506_v35 = vpop.f32.mrb[36].mxu1 }
 0x49c   : > { %v1728_v37 = vadd.f32 %v2506_v35, %v3245_v16  ;;  %v1719_v39 = vpop.f32.mrb[37].mxu1 }
 0x49d   : > { %v1720_v3 = vadd.f32 %v3245_v16, %v1719_v39  ;;  %v2507_v9 = vpop.f32.mrb[38].mxu1 }
 0x49e   : > { %v1788_v40 = vmul.f32 0.15, %v1728_v37  ;;  %v1731_v38 = vadd.f32 %v2507_v9, %v3245_v16  ;;  %v1722_v42 = vpop.f32.mrb[39].mxu1  ;;  %vm1772_vm4 = vcmp.gt.f32.partialorder %v1728_v37, 0.0 }
 0x49f   : > { %v1786_v43 = vmul.f32 0.15, %v1720_v3  ;;  %v1723_v45 = vadd.f32 %v3245_v16, %v1722_v42  ;;  %vm1770_vm5 = vcmp.gt.f32.partialorder %v1720_v3, 0.0 }
 0x4a0   : > { %vm1773_vm6 = vcmp.gt.f32.partialorder %v1731_v38, 0.0  ;;  %v1789_v10 = vmul.f32 0.15, %v1731_v38  ;;  %v1804_v46 = vsel %vm1772_vm4, %v1728_v37, %v1788_v40 }
 0x4a1   : > { %vm1771_vm7 = vcmp.gt.f32.partialorder %v1723_v45, 0.0  ;;  %v1787_v44 = vmul.f32 0.15, %v1723_v45  ;;  %v1802_v36 = vsel %vm1770_vm5, %v1720_v3, %v1786_v43 }
 0x4a2   : > { %v1805_v41 = vsel %vm1773_vm6, %v1731_v38, %v1789_v10 }
 0x4a3   : > { %v1803_v48 = vsel %vm1771_vm7, %v1723_v45, %v1787_v44  ;;  %v1817_v51 = vpack.c.bf16 %v1805_v41, %v1804_v46 }
 0x4a4   : > { %v1816_v52 = vpack.c.bf16 %v1803_v48, %v1802_v36 }
 0x4a6   : > { %2536 = vmatprep.mubr.bf16.mxu0 %v1816_v52 }
 0x4a7   : > { %2537 = vmatmul.mubr.bf16.gmra.mrb[52].mxu0 %v1817_v51 }
 0x4ab   : > { %v2510_v53 = vpop.f32.mrb[40].mxu1 }
 0x4ac   : > { %v1744_v47 = vadd.f32 %v2510_v53, %v3245_v16  ;;  %v1735_v54 = vpop.f32.mrb[41].mxu1 }
 0x4ad   : > { %v1736_v55 = vadd.f32 %v3245_v16, %v1735_v54  ;;  %v2511_v56 = vpop.f32.mrb[42].mxu1 }
 0x4ae   : > { %v1792_v57 = vmul.f32 0.15, %v1744_v47  ;;  %v1747_v58 = vadd.f32 %v2511_v56, %v3245_v16  ;;  %v1738_v60 = vpop.f32.mrb[43].mxu1  ;;  %vm1776_vm8 = vcmp.gt.f32.partialorder %v1744_v47, 0.0 }
 0x4af   : > { %v1790_v50 = vmul.f32 0.15, %v1736_v55  ;;  %v1739_v61 = vadd.f32 %v3245_v16, %v1738_v60  ;;  %vm1774_vm9 = vcmp.gt.f32.partialorder %v1736_v55, 0.0 }
 0x4b0   : > { %vm1777_vm10 = vcmp.gt.f32.partialorder %v1747_v58, 0.0  ;;  %v1793_v62 = vmul.f32 0.15, %v1747_v58  ;;  %v1808_v63 = vsel %vm1776_vm8, %v1744_v47, %v1792_v57 }
 0x4b1   : > { %vm1775_vm11 = vcmp.gt.f32.partialorder %v1739_v61, 0.0  ;;  %v1791_v49 = vmul.f32 0.15, %v1739_v61  ;;  %v1806_v4 = vsel %vm1774_vm9, %v1736_v55, %v1790_v50 }
 0x4b2   : > { %v1809_v59 = vsel %vm1777_vm10, %v1747_v58, %v1793_v62 }
 0x4b3   : > { %v1819_v0 = vpack.c.bf16 %v1809_v59, %v1808_v63  ;;  %v1807_v5 = vsel %vm1775_vm11, %v1739_v61, %v1791_v49 }
 0x4b4   : > { %v1818_v6 = vpack.c.bf16 %v1807_v5, %v1806_v4 }
 0x4b6   : > { %2540 = vmatprep.mubr.bf16.mxu1 %v1818_v6 }
 0x4b7   : > { %2541 = vmatmul.mubr.bf16.vlgmr.msra.gmra.mrb[48].mxu1 %v1819_v0 }
 0x4bb   : > { %v2514_v1 = vpop.f32.mrb[44].mxu1 }
 0x4bc   : > { %v1760_v7 = vadd.f32 %v2514_v1, %v3245_v16  ;;  %v1751_v8 = vpop.f32.mrb[45].mxu1 }
 0x4bd   : > { %v1752_v11 = vadd.f32 %v3245_v16, %v1751_v8  ;;  %v2515_v12 = vpop.f32.mrb[46].mxu1 }
 0x4be   : > { %v1796_v13 = vmul.f32 0.15, %v1760_v7  ;;  %v1763_v14 = vadd.f32 %v2515_v12, %v3245_v16  ;;  %v1754_v2 = vpop.f32.mrb[47].mxu1  ;;  %vm1780_vm12 = vcmp.gt.f32.partialorder %v1760_v7, 0.0 }
 0x4bf   : > { %v1794_v15 = vmul.f32 0.15, %v1752_v11  ;;  %v1755_v18 = vadd.f32 %v3245_v16, %v1754_v2  ;;  %vm1778_vm13 = vcmp.gt.f32.partialorder %v1752_v11, 0.0 }
 0x4c0   : > { %vm1781_vm14 = vcmp.gt.f32.partialorder %v1763_v14, 0.0  ;;  %v1797_v19 = vmul.f32 0.15, %v1763_v14  ;;  %v1812_v21 = vsel %vm1780_vm12, %v1760_v7, %v1796_v13 }
 0x4c1   : > { %vm1779_vm15 = vcmp.gt.f32.partialorder %v1755_v18, 0.0  ;;  %v1795_v20 = vmul.f32 0.15, %v1755_v18  ;;  %v1810_v23 = vsel %vm1778_vm13, %v1752_v11, %v1794_v15 }
 0x4c2   : > { %v1813_v22 = vsel %vm1781_vm14, %v1763_v14, %v1797_v19 }
 0x4c3   : > { %v1811_v24 = vsel %vm1779_vm15, %v1755_v18, %v1795_v20  ;;  %v1821_v26 = vpack.c.bf16 %v1813_v22, %v1812_v21 }
 0x4c4   : > { %v1820_v27 = vpack.c.bf16 %v1811_v24, %v1810_v23 }
 0x4c6   : > { %2544 = vmatprep.mubr.bf16.mxu1 %v1820_v27 }
 0x4c7   : > { %2545 = vmatmul.mubr.bf16.gmra.mrb[52].mxu1 %v1821_v26 }
 0x56a   : > { %v2534_v28 = vpop.f32.mrb[48].mxu0 }
 0x56b   : > { %v1936_v16 = vadd.f32 %v2534_v28, %v3266_v17  ;;  %v1927_v29 = vpop.f32.mrb[49].mxu0 }
 0x56c   : > { %v1928_v25 = vadd.f32 %v3266_v17, %v1927_v29  ;;  %v2535_v30 = vpop.f32.mrb[50].mxu0 }
 0x56d   : > { %v1992_v31 = vsub.f32 0.0, %v1936_v16  ;;  %v1939_v32 = vadd.f32 %v2535_v30, %v3266_v17  ;;  %v1930_v33 = vpop.f32.mrb[51].mxu0 }
 0x56e   : > { %v1990_v34 = vsub.f32 0.0, %v1928_v25  ;;  %v1931_v35 = vadd.f32 %v3266_v17, %v1930_v33 }
 0x56f   : > { %v2010_v37 = vmul.f32 1.442695, %v1992_v31  ;;  %v1993_v39 = vsub.f32 0.0, %v1939_v32 }
 0x570   : > { %v2006_v3 = vmul.f32 1.442695, %v1990_v34  ;;  %v1991_v9 = vsub.f32 0.0, %v1931_v35 }
 0x571   : > { %2677 = vpow2.f32 %v2010_v37  ;;  %v2012_v40 = vmul.f32 1.442695, %v1993_v39 }
 0x572   : > { %2679 = vpow2.f32 %v2006_v3  ;;  %v2008_v38 = vmul.f32 1.442695, %v1991_v9 }
 0x573   : > { %2681 = vpow2.f32 %v2012_v40 }
 0x574   : > { %2683 = vpow2.f32 %v2008_v38 }
 0x57a   : > { %v2538_v42 = vpop.f32.mrb[52].mxu0 }
 0x57b   : > { %v2678_v43 = vpop.eup %2677  ;;  %v1952_v45 = vadd.f32 %v2538_v42, %v3266_v17  ;;  %v1943_v10 = vpop.f32.mrb[53].mxu0 }
 0x57c   : > { %v2680_v44 = vpop.eup %2679  ;;  %v2040_v46 = vadd.f32 1.0, %v2678_v43  ;;  %v1944_v41 = vadd.f32 %v3266_v17, %v1943_v10  ;;  %v2539_v36 = vpop.f32.mrb[54].mxu0 }
 0x57d   : > { %v2682_v48 = vpop.eup %2681  ;;  %v2038_v51 = vadd.f32 1.0, %v2680_v44  ;;  %v1996_v52 = vsub.f32 0.0, %v1952_v45  ;;  %v1955_v53 = vadd.f32 %v2539_v36, %v3266_v17  ;;  %v1946_v47 = vpop.f32.mrb[55].mxu0 }
 0x57e   : > { %v2684_v54 = vpop.eup %2683  ;;  %2685 = vrcp.f32 %v2040_v46  ;;  %v2041_v55 = vadd.f32 1.0, %v2682_v48  ;;  %v1994_v56 = vsub.f32 0.0, %v1944_v41  ;;  %v1947_v57 = vadd.f32 %v3266_v17, %v1946_v47 }
 0x57f   : > { %2687 = vrcp.f32 %v2038_v51  ;;  %v2039_v58 = vadd.f32 1.0, %v2684_v54  ;;  %v2018_v60 = vmul.f32 1.442695, %v1996_v52  ;;  %v1997_v50 = vsub.f32 0.0, %v1955_v53 }
 0x580   : > { %2689 = vrcp.f32 %v2041_v55  ;;  %v2014_v61 = vmul.f32 1.442695, %v1994_v56  ;;  %v1995_v62 = vsub.f32 0.0, %v1947_v57 }
 0x581   : > { %2691 = vrcp.f32 %v2039_v58  ;;  %v2020_v49 = vmul.f32 1.442695, %v1997_v50 }
 0x582   : > { %2693 = vpow2.f32 %v2018_v60  ;;  %v2016_v63 = vmul.f32 1.442695, %v1995_v62 }
 0x583   : > { %2695 = vpow2.f32 %v2014_v61 }
 0x584   : > { %2697 = vpow2.f32 %v2020_v49 }
 0x585   : > { %2699 = vpow2.f32 %v2016_v63 }
 0x588   : > { %v2686_v59 = vpop.eup %2685 }
 0x589   : > { %v2688_v0 = vpop.eup %2687  ;;  %2104 = vst [vmem:[%s3281_s19 + $0x10] sm:$0xff] %v2686_v59 }
 0x58a   : > { %v2690_v4 = vpop.eup %2689  ;;  %2102 = vst [vmem:[%s3281_s19] sm:$0xff] %v2688_v0  ;;  %v2542_v5 = vpop.f32.mrb[48].mxu1 }
 0x58b   : > { %v2692_v6 = vpop.eup %2691  ;;  %2105 = vst [vmem:[%s3281_s19 + $0x18] sm:$0xff] %v2690_v4  ;;  %v1968_v1 = vadd.f32 %v2542_v5, %v3266_v17  ;;  %v1959_v7 = vpop.f32.mrb[49].mxu1 }
 0x58c   : > { %v2694_v8 = vpop.eup %2693  ;;  %2103 = vst [vmem:[%s3281_s19 + $0x8] sm:$0xff] %v2692_v6  ;;  %v1960_v11 = vadd.f32 %v3266_v17, %v1959_v7  ;;  %v2543_v12 = vpop.f32.mrb[50].mxu1 }
 0x58d   : > { %v2696_v13 = vpop.eup %2695  ;;  %v2044_v14 = vadd.f32 1.0, %v2694_v8  ;;  %v2000_v2 = vsub.f32 0.0, %v1968_v1  ;;  %v1971_v15 = vadd.f32 %v2543_v12, %v3266_v17  ;;  %v1962_v18 = vpop.f32.mrb[51].mxu1 }
 0x58e   : > { %v2698_v19 = vpop.eup %2697  ;;  %v2042_v20 = vadd.f32 1.0, %v2696_v13  ;;  %v1998_v21 = vsub.f32 0.0, %v1960_v11  ;;  %v1963_v22 = vadd.f32 %v3266_v17, %v1962_v18 }
 0x58f   : > { %v2700_v23 = vpop.eup %2699  ;;  %2701 = vrcp.f32 %v2044_v14  ;;  %v2045_v24 = vadd.f32 1.0, %v2698_v19  ;;  %v2026_v26 = vmul.f32 1.442695, %v2000_v2  ;;  %v2001_v27 = vsub.f32 0.0, %v1971_v15 }
 0x590   : > { %2703 = vrcp.f32 %v2042_v20  ;;  %v2043_v28 = vadd.f32 1.0, %v2700_v23  ;;  %v2022_v16 = vmul.f32 1.442695, %v1998_v21  ;;  %v1999_v29 = vsub.f32 0.0, %v1963_v22 }
 0x591   : > { %2705 = vrcp.f32 %v2045_v24  ;;  %v2028_v25 = vmul.f32 1.442695, %v2001_v27 }
 0x592   : > { %2707 = vrcp.f32 %v2043_v28  ;;  %v2024_v30 = vmul.f32 1.442695, %v1999_v29 }
 0x593   : > { %2709 = vpow2.f32 %v2026_v26 }
 0x594   : > { %2711 = vpow2.f32 %v2022_v16 }
 0x595   : > { %2713 = vpow2.f32 %v2028_v25 }
 0x596   : > { %2715 = vpow2.f32 %v2024_v30 }
 0x599   : > { %v2702_v31 = vpop.eup %2701 }
 0x59a   : > { %v2704_v32 = vpop.eup %2703  ;;  %2108 = vst [vmem:[%s3281_s19 + $0x30] sm:$0xff] %v2702_v31  ;;  %v2546_v33 = vpop.f32.mrb[52].mxu1 }
 0x59b   : > { %v2706_v34 = vpop.eup %2705  ;;  %2106 = vst [vmem:[%s3281_s19 + $0x20] sm:$0xff] %v2704_v32  ;;  %v1984_v35 = vadd.f32 %v2546_v33, %v3266_v17  ;;  %v1975_v37 = vpop.f32.mrb[53].mxu1 }
 0x59c   : > { %v2708_v39 = vpop.eup %2707  ;;  %2109 = vst [vmem:[%s3281_s19 + $0x38] sm:$0xff] %v2706_v34  ;;  %v1976_v3 = vadd.f32 %v3266_v17, %v1975_v37  ;;  %v2547_v9 = vpop.f32.mrb[54].mxu1 }
 0x59d   : > { %v2710_v40 = vpop.eup %2709  ;;  %2107 = vst [vmem:[%s3281_s19 + $0x28] sm:$0xff] %v2708_v39  ;;  %v2004_v38 = vsub.f32 0.0, %v1984_v35  ;;  %v1987_v42 = vadd.f32 %v2547_v9, %v3266_v17  ;;  %v1978_v43 = vpop.f32.mrb[55].mxu1 }
 0x59e   : > { %v2712_v45 = vpop.eup %2711  ;;  %v2048_v10 = vadd.f32 1.0, %v2710_v40  ;;  %v2002_v44 = vsub.f32 0.0, %v1976_v3  ;;  %v1979_v46 = vadd.f32 %v3266_v17, %v1978_v43 }
 0x59f   : > { %v2714_v41 = vpop.eup %2713  ;;  %v2046_v36 = vadd.f32 1.0, %v2712_v45  ;;  %v2005_v48 = vsub.f32 0.0, %v1987_v42  ;;  %v2034_v53 = vmul.f32 1.442695, %v2004_v38 }
 0x5a0   : > { %v2716_v51 = vpop.eup %2715  ;;  %2717 = vrcp.f32 %v2048_v10  ;;  %v2049_v52 = vadd.f32 1.0, %v2714_v41  ;;  %v2003_v47 = vsub.f32 0.0, %v1979_v46  ;;  %v2030_v55 = vmul.f32 1.442695, %v2002_v44 }
 0x5a1   : > { %2719 = vrcp.f32 %v2046_v36  ;;  %v2047_v54 = vadd.f32 1.0, %v2716_v51  ;;  %v2036_v56 = vmul.f32 1.442695, %v2005_v48 }
 0x5a2   : > { %2721 = vrcp.f32 %v2049_v52  ;;  %v2032_v57 = vmul.f32 1.442695, %v2003_v47 }
 0x5a3   : > { %2723 = vrcp.f32 %v2047_v54 }
 0x5a4   : > { %2725 = vpow2.f32 %v2034_v53 }
 0x5a5   : > { %2727 = vpow2.f32 %v2030_v55 }
 0x5a6   : > { %2729 = vpow2.f32 %v2036_v56 }
 0x5a7   : > { %2731 = vpow2.f32 %v2032_v57 }
 0x5aa   : > { %v2718_v17 = vpop.eup %2717 }
 0x5ab   : > { %v2720_v58 = vpop.eup %2719  ;;  %2112 = vst [vmem:[%s3281_s19 + $0x50] sm:$0xff] %v2718_v17 }
 0x5ac   : > { %v2722_v60 = vpop.eup %2721  ;;  %2110 = vst [vmem:[%s3281_s19 + $0x40] sm:$0xff] %v2720_v58 }
 0x5ad   : > { %v2724_v50 = vpop.eup %2723  ;;  %2113 = vst [vmem:[%s3281_s19 + $0x58] sm:$0xff] %v2722_v60 }
 0x5ae   : > { %v2726_v61 = vpop.eup %2725  ;;  %2111 = vst [vmem:[%s3281_s19 + $0x48] sm:$0xff] %v2724_v50 }
 0x5af   : > { %v2728_v62 = vpop.eup %2727  ;;  %v2052_v49 = vadd.f32 1.0, %v2726_v61 }
 0x5b0   : > { %v2730_v63 = vpop.eup %2729  ;;  %v2050_v59 = vadd.f32 1.0, %v2728_v62 }
 0x5b1   : > { %v2732_v0 = vpop.eup %2731  ;;  %2733 = vrcp.f32 %v2052_v49  ;;  %v2053_v4 = vadd.f32 1.0, %v2730_v63 }
 0x5b2   : > { %2735 = vrcp.f32 %v2050_v59  ;;  %v2051_v5 = vadd.f32 1.0, %v2732_v0 }
 0x5b3   : > { %2737 = vrcp.f32 %v2053_v4 }
 0x5b4   : > { %2739 = vrcp.f32 %v2051_v5 }
 0x5bb   : > { %v2734_v6 = vpop.eup %2733 }
 0x5bc   : > { %v2736_v1 = vpop.eup %2735  ;;  %2116 = vst [vmem:[%s3281_s19 + $0x70] sm:$0xff] %v2734_v6 }
 0x5bd   : > { %v2738_v7 = vpop.eup %2737  ;;  %2114 = vst [vmem:[%s3281_s19 + $0x60] sm:$0xff] %v2736_v1 }
 0x5be   : > { %v2740_v8 = vpop.eup %2739  ;;  %2117 = vst [vmem:[%s3281_s19 + $0x78] sm:$0xff] %v2738_v7 }
 0x5bf   : > { %2115 = vst [vmem:[%s3281_s19 + $0x68] sm:$0xff] %v2740_v8 }
 0x5c0 PF: > { %s26_s18 = sadd.s32 1, %s2747_s18  }
 0x5c1   : > { %p23_p4 = scmp.ge.s32.totalorder %s26_s18, 4  }
 0x5c3   :  { %25 = sbr.rel (!%p23_p4) target bundleno = 1 (0x1), region = 121 }

</bundles_post_ra>
